<compile_context>
chip_gen: v7x
topology: tpu7x:2x2x1
jax: 0.10.0
libtpu: 0.0.40
codegen_flags: <defaults>
</compile_context>

<pallas_src>
import functools

import jax
import jax.numpy as jnp
import numpy as np
from jax.experimental import pallas as pl
from jax.experimental.pallas import tpu as pltpu

EPS = 1e-5

# MXU operand dtype. bf16 halves weight HBM->VMEM bytes and runs on the
# bf16-native MXU; BN statistics / normalization / residual stay f32.
# Flip to jnp.float32 for a bit-tight (1e-4) match against the f32 reference.
MXU_DTYPE = jnp.bfloat16


def _block_kernel(xp_ref, bw1_ref, bw2_ref, g1_ref, b1_ref, g2_ref, b2_ref,
                  gat_ref, bcast_ref, out_ref, ypad_ref):
    """Whole residual block, grid-less, in the lane-dense (rows, W*C) layout.

    xp_ref    : (N, H+2, W*C) f32   input, H zero-padded, (w, c) on lanes
    bw*_ref   : (3, W*C, W*C) bf16  banded conv weights (one slab per kh tap;
                                    kw taps + W zero padding folded in)
    g*/b*_ref : (1, W*C)      f32   batchnorm gamma / beta, pre-tiled over w
    gat_ref   : (W*C, C)      f32   lane -> channel gather, scaled 1/(N*H*W)
    bcast_ref : (C, W*C)      f32   channel -> lane broadcast
    out_ref   : (N*H, W*C)    f32   output rows, lane-dense
    ypad_ref  : (N, H+2, W*C) bf16  VMEM scratch: H-padded conv1 activation
    """
    N, HP, L = xp_ref.shape
    H = HP - 2
    M = N * H

    def conv3x3(src_ref, bw_ref):
        # One (M, L) x (L, L) bf16 matmul per kh tap (3 total), f32 accumulate.
        # astype is a no-op when src is already bf16 (the ypad scratch).
        acc = jnp.zeros((M, L), jnp.float32)
        for kh in range(3):
            lhs = src_ref[:, pl.ds(kh, H), :].reshape(M, L).astype(MXU_DTYPE)
            acc = acc + jnp.dot(lhs, bw_ref[kh],
                                preferred_element_type=jnp.float32)
        return acc

    def bn_coeffs(h, g_ref, b_ref):
        # One-pass training-mode BN statistics in f32: stack per-lane sum and
        # sum-of-squares into a single (2, L) operand, reduce over the W lane
        # groups with one (2,L)@(L,C) matmul, broadcast back per lane with one
        # (2,C)@(C,L) matmul.  Returns fused scale/shift so normalization is a
        # single multiply-add epilogue.
        s = jnp.concatenate(
            [jnp.sum(h, axis=0, keepdims=True),
             jnp.sum(h * h, axis=0, keepdims=True)], axis=0)          # (2, L)
        per_c = jnp.dot(s, gat_ref[...],
                        preferred_element_type=jnp.float32)           # (2, C)
        stats = jnp.dot(per_c, bcast_ref[...],
                        preferred_element_type=jnp.float32)           # (2, L)
        mean = stats[0:1, :]
        ex2 = stats[1:2, :]
        var = ex2 - mean * mean
        inv = jax.lax.rsqrt(var + EPS)
        scale = g_ref[...] * inv
        shift = b_ref[...] - mean * scale
        return scale, shift

    # ---- conv1 -> BN1 -> ReLU ---------------------------------------------
    h1 = conv3x3(xp_ref, bw1_ref)
    sc1, sh1 = bn_coeffs(h1, g1_ref, b1_ref)
    y1 = jnp.maximum(h1 * sc1 + sh1, 0.0)                             # (M, L)

    # H-pad the intermediate for conv2 (bf16 scratch): zero only the two
    # border rows per image; interior written once, full lane width, as bf16.
    ypad_ref[:, 0:1, :] = jnp.zeros((N, 1, L), ypad_ref.dtype)
    ypad_ref[:, HP - 1:HP, :] = jnp.zeros((N, 1, L), ypad_ref.dtype)
    ypad_ref[:, pl.ds(1, H), :] = y1.reshape(N, H, L).astype(ypad_ref.dtype)

    # ---- conv2 -> BN2 -> residual add (fused epilogue, lane-dense store) ---
    h2 = conv3x3(ypad_ref, bw2_ref)
    sc2, sh2 = bn_coeffs(h2, g2_ref, b2_ref)
    x_in = xp_ref[:, pl.ds(1, H), :].reshape(M, L)
    out_ref[...] = x_in + h2 * sc2 + sh2


def prepare_block_params(w1_oihw, w2_oihw, g1, b1, g2, b2, *, N, H, W):
    """Precompute everything weight-/shape-dependent ONCE per weight update.

    Returns a pytree of device arrays closed over by block_forward, so the
    per-call path is pure layout plumbing + the pallas_call.
    """
    C = w1_oihw.shape[0]
    L = W * C

    # Conv weights OIHW -> HWIO -> per-kh banded (L, L) block matrices:
    #   bw[kh][wi*C + ci, wo*C + co] = w_hwio[kh, kw, ci, co] with wi = wo+kw-1
    # (out-of-range wi omitted), folding the kw taps and the W-direction zero
    # padding into one lane-dense contraction of depth K = W*C.  Built in f32,
    # shipped in bf16 (halves weight DMA, feeds the bf16 MXU directly).
    def banded(w_oihw):
        w_hwio = jnp.transpose(w_oihw, (2, 3, 1, 0)).astype(jnp.float32)
        slabs = [
            sum(jnp.kron(jnp.eye(W, k=1 - kw, dtype=jnp.float32),
                         w_hwio[kh, kw])
                for kw in range(3))
            for kh in range(3)
        ]
        return jnp.stack(slabs).astype(MXU_DTYPE)

    # BN gamma/beta tiled over w so they broadcast per-lane inside the kernel.
    def tile_wc(v):
        return jnp.tile(v.astype(jnp.float32), (W,)).reshape(1, L)

    # Small factored BN reduction matrices (replace the old 256 KiB `red`):
    #   gat[l, c]   = (l % C == c) / (N*H*W)   -> per-channel mean/E[x^2]
    #   bcast[c, l] = (l % C == c)             -> broadcast back to every lane
    lane_c = np.arange(L) % C
    gat = jnp.asarray(
        (lane_c[:, None] == np.arange(C)[None, :]).astype(np.float32)
        / float(N * H * W))
    bcast = jnp.asarray(
        (np.arange(C)[:, None] == lane_c[None, :]).astype(np.float32))

    return (banded(w1_oihw), banded(w2_oihw),
            tile_wc(g1), tile_wc(b1), tile_wc(g2), tile_wc(b2),
            gat, bcast)


@jax.jit
def block_forward(x_nchw, params):
    """Jitted forward: layout plumbing + pallas_call.  x_nchw: (N,C,H,W) f32."""
    bw1, bw2, g1r, b1r, g2r, b2r, gat, bcast = params
    N, C, H, W = x_nchw.shape
    L = W * C
    # Lane/sublane density assumptions of the kernel (full 128-lane stores,
    # 8-row sublane tiles).  Other shapes need masked stores / a different
    # tiling and are not supported by this kernel.
    assert L % 128 == 0, f"W*C={L} must be a multiple of 128 lanes"
    assert (N * H) % 8 == 0, f"N*H={N * H} must be a multiple of 8 sublanes"

    # NCHW -> NHWC -> fold (w, c) onto the lane axis, zero-pad H by 1.
    x_rows = jnp.transpose(x_nchw, (0, 2, 3, 1)).reshape(N, H, L)
    x_pad = jnp.pad(x_rows, ((0, 0), (1, 1), (0, 0)))

    # Advisory cost estimate so XLA can overlap the surrounding relayouts.
    flops = 2 * (N * H) * L * L * 6          # 3 taps x 2 convs
    bytes_accessed = (x_pad.size * 4 + (bw1.size + bw2.size) * 2
                      + 4 * L * 4 + (gat.size + bcast.size) * 4
                      + N * H * L * 4)

    vmem = pl.BlockSpec(memory_space=pltpu.MemorySpace.VMEM)
    out_rows = pl.pallas_call(
        _block_kernel,
        out_shape=jax.ShapeDtypeStruct((N * H, L), jnp.float32),
        in_specs=[vmem] * 9,
        out_specs=vmem,
        scratch_shapes=[pltpu.VMEM((N, H + 2, L), MXU_DTYPE)],
        cost_estimate=pl.CostEstimate(flops=flops, transcendentals=2 * L,
                                      bytes_accessed=bytes_accessed),
    )(x_pad, bw1, bw2, g1r, b1r, g2r, b2r, gat, bcast)

    # (N*H, W*C) -> (N, H, W, C) -> NCHW
    return jnp.transpose(out_rows.reshape(N, H, W, C), (0, 3, 1, 2))


# ---------------------------------------------------------------------------
# Parameter setup (deterministic, in-script).  Spectral norm is applied to the
# conv weights like torch.nn.utils.spectral_norm: one power iteration on the
# (C_out, C_in*3*3) matrix with a fixed random u, then W / sigma.
# ---------------------------------------------------------------------------
def spectral_normalize(w_oihw, key, n_iter=1, eps=1e-12):
    c_out = w_oihw.shape[0]
    w_mat = w_oihw.reshape(c_out, -1)
    u = jax.random.normal(key, (c_out,), jnp.float32)
    u = u / (jnp.linalg.norm(u) + eps)
    v = None
    for _ in range(n_iter):
        v = w_mat.T @ u
        v = v / (jnp.linalg.norm(v) + eps)
        u = w_mat @ v
        u = u / (jnp.linalg.norm(u) + eps)
    sigma = u @ (w_mat @ v)
    return w_oihw / sigma


def reference_block(x, w1, w2, g1, b1, g2, b2):
    """Pure-JAX f32 reference (NCHW), mirrors the PyTorch forward in train mode."""
    def conv(xx, ww):
        return jax.lax.conv_general_dilated(
            xx, ww, window_strides=(1, 1), padding="SAME",
            dimension_numbers=("NCHW", "OIHW", "NCHW"))

    def bn(xx, g, b):
        mean = xx.mean(axis=(0, 2, 3), keepdims=True)
        var = ((xx - mean) ** 2).mean(axis=(0, 2, 3), keepdims=True)
        return ((xx - mean) * jax.lax.rsqrt(var + EPS)
                * g.reshape(1, -1, 1, 1) + b.reshape(1, -1, 1, 1))

    h = jax.nn.relu(bn(conv(x, w1), g1, b1))
    h = bn(conv(h, w2), g2, b2)
    return x + h


if __name__ == "__main__":
    key = jax.random.PRNGKey(0)
    k_x, k_w1, k_w2, k_u1, k_u2 = jax.random.split(key, 5)

    N, C, H, W = 2, 16, 16, 16  # small synthetic shapes (NCHW like PyTorch)

    x = jax.random.normal(k_x, (N, C, H, W), jnp.float32)

    # Conv2d(in_channels, in_channels, 3, 1, 1, bias=False) -> weight OIHW
    w1 = jax.random.normal(k_w1, (C, C, 3, 3), jnp.float32) * 0.1
    w2 = jax.random.normal(k_w2, (C, C, 3, 3), jnp.float32) * 0.1
    w1 = spectral_normalize(w1, k_u1)
    w2 = spectral_normalize(w2, k_u2)

    # BatchNorm2d default init: gamma = 1, beta = 0
    g1 = jnp.ones((C,), jnp.float32)
    b1 = jnp.zeros((C,), jnp.float32)
    g2 = jnp.ones((C,), jnp.float32)
    b2 = jnp.zeros((C,), jnp.float32)

    # Weight-dependent preprocessing done ONCE (hoisted out of the call path).
    params = jax.block_until_ready(
        prepare_block_params(w1, w2, g1, b1, g2, b2, N=N, H=H, W=W))

    out = jax.block_until_ready(block_forward(x, params))
    ref = jax.block_until_ready(reference_block(x, w1, w2, g1, b1, g2, b2))

    assert out.shape == (N, C, H, W)
    # bf16 MXU operands -> loosened tolerance vs. the f32 reference.
    assert jnp.allclose(out, ref, atol=3e-2, rtol=3e-2), (
        float(jnp.max(jnp.abs(out - ref))))

    print("KERNEL_OK")
</pallas_src>

<mosaic_0001>
module attributes {stable_mosaic.version = 11 : i64} {
  func.func @_block_kernel(%arg0: memref<2x18x256xf32, #tpu.memory_space<vmem>>, %arg1: memref<3x256x256xbf16, #tpu.memory_space<vmem>>, %arg2: memref<3x256x256xbf16, #tpu.memory_space<vmem>>, %arg3: memref<1x256xf32, #tpu.memory_space<vmem>>, %arg4: memref<1x256xf32, #tpu.memory_space<vmem>>, %arg5: memref<1x256xf32, #tpu.memory_space<vmem>>, %arg6: memref<1x256xf32, #tpu.memory_space<vmem>>, %arg7: memref<256x16xf32, #tpu.memory_space<vmem>>, %arg8: memref<16x256xf32, #tpu.memory_space<vmem>>, %arg9: memref<32x256xf32, #tpu.memory_space<vmem>>, %arg10: memref<2x18x256xbf16, #tpu.memory_space<vmem>>) attributes {dimension_semantics = [], scalar_prefetch = 0 : i64, scratch_operands = 1 : i64, tpu.core_type = #tpu.core_type<tc>} {
    %cst = arith.constant 0.000000e+00 : f32
    %0 = vector.broadcast %cst : f32 to vector<32x256xf32>
    %c0 = arith.constant 0 : index
    %c0_0 = arith.constant 0 : index
    %c0_1 = arith.constant 0 : index
    %1 = vector.load %arg0[%c0, %c0_0, %c0_1] : memref<2x18x256xf32, #tpu.memory_space<vmem>>, vector<2x16x256xf32>
    %2 = vector.shape_cast %1 : vector<2x16x256xf32> to vector<32x256xf32>
    %3 = arith.truncf %2 : vector<32x256xf32> to vector<32x256xbf16>
    %c0_2 = arith.constant 0 : index
    %c0_3 = arith.constant 0 : index
    %c0_4 = arith.constant 0 : index
    %4 = vector.load %arg1[%c0_2, %c0_3, %c0_4] : memref<3x256x256xbf16, #tpu.memory_space<vmem>>, vector<1x256x256xbf16>
    %5 = vector.shape_cast %4 : vector<1x256x256xbf16> to vector<256x256xbf16>
    %cst_5 = arith.constant dense<0.000000e+00> : vector<32x256xf32>
    %6 = tpu.matmul %3, %5, %cst_5 {dimension_numbers = #tpu.dot_dimension_numbers<[1], [0], [0], [1], [0, 0, 1, 1], [], []>} : vector<32x256xbf16>, vector<256x256xbf16>, vector<32x256xf32> -> vector<32x256xf32>
    %7 = arith.addf %0, %6 : vector<32x256xf32>
    %c0_6 = arith.constant 0 : index
    %c1 = arith.constant 1 : index
    %c0_7 = arith.constant 0 : index
    %8 = vector.load %arg0[%c0_6, %c1, %c0_7] : memref<2x18x256xf32, #tpu.memory_space<vmem>>, vector<2x16x256xf32>
    %9 = vector.shape_cast %8 : vector<2x16x256xf32> to vector<32x256xf32>
    %10 = arith.truncf %9 : vector<32x256xf32> to vector<32x256xbf16>
    %c1_8 = arith.constant 1 : index
    %c0_9 = arith.constant 0 : index
    %c0_10 = arith.constant 0 : index
    %11 = vector.load %arg1[%c1_8, %c0_9, %c0_10] : memref<3x256x256xbf16, #tpu.memory_space<vmem>>, vector<1x256x256xbf16>
    %12 = vector.shape_cast %11 : vector<1x256x256xbf16> to vector<256x256xbf16>
    %cst_11 = arith.constant dense<0.000000e+00> : vector<32x256xf32>
    %13 = tpu.matmul %10, %12, %cst_11 {dimension_numbers = #tpu.dot_dimension_numbers<[1], [0], [0], [1], [0, 0, 1, 1], [], []>} : vector<32x256xbf16>, vector<256x256xbf16>, vector<32x256xf32> -> vector<32x256xf32>
    %14 = arith.addf %7, %13 : vector<32x256xf32>
    %c0_12 = arith.constant 0 : index
    %c2 = arith.constant 2 : index
    %c0_13 = arith.constant 0 : index
    %15 = vector.load %arg0[%c0_12, %c2, %c0_13] : memref<2x18x256xf32, #tpu.memory_space<vmem>>, vector<2x16x256xf32>
    %16 = vector.shape_cast %15 : vector<2x16x256xf32> to vector<32x256xf32>
    %17 = arith.truncf %16 : vector<32x256xf32> to vector<32x256xbf16>
    %c2_14 = arith.constant 2 : index
    %c0_15 = arith.constant 0 : index
    %c0_16 = arith.constant 0 : index
    %18 = vector.load %arg1[%c2_14, %c0_15, %c0_16] : memref<3x256x256xbf16, #tpu.memory_space<vmem>>, vector<1x256x256xbf16>
    %19 = vector.shape_cast %18 : vector<1x256x256xbf16> to vector<256x256xbf16>
    %cst_17 = arith.constant dense<0.000000e+00> : vector<32x256xf32>
    %20 = tpu.matmul %17, %19, %cst_17 {dimension_numbers = #tpu.dot_dimension_numbers<[1], [0], [0], [1], [0, 0, 1, 1], [], []>} : vector<32x256xbf16>, vector<256x256xbf16>, vector<32x256xf32> -> vector<32x256xf32>
    %21 = arith.addf %14, %20 : vector<32x256xf32>
    %cst_18 = arith.constant dense<0.000000e+00> : vector<256xf32>
    %22 = vector.multi_reduction <add>, %21, %cst_18 [0] : vector<32x256xf32> to vector<256xf32>
    %23 = vector.shape_cast %22 : vector<256xf32> to vector<1x256xf32>
    %24 = arith.mulf %21, %21 : vector<32x256xf32>
    %cst_19 = arith.constant dense<0.000000e+00> : vector<256xf32>
    %25 = vector.multi_reduction <add>, %24, %cst_19 [0] : vector<32x256xf32> to vector<256xf32>
    %26 = vector.shape_cast %25 : vector<256xf32> to vector<1x256xf32>
    %27 = tpu.concatenate %23, %26 in 0 : vector<1x256xf32>, vector<1x256xf32> -> vector<2x256xf32>
    %c0_20 = arith.constant 0 : index
    %c0_21 = arith.constant 0 : index
    %28 = vector.load %arg7[%c0_20, %c0_21] : memref<256x16xf32, #tpu.memory_space<vmem>>, vector<256x16xf32>
    %cst_22 = arith.constant dense<0.000000e+00> : vector<2x16xf32>
    %29 = tpu.matmul %27, %28, %cst_22 {dimension_numbers = #tpu.dot_dimension_numbers<[1], [0], [0], [1], [0, 0, 1, 1], [], []>} : vector<2x256xf32>, vector<256x16xf32>, vector<2x16xf32> -> vector<2x16xf32>
    %c0_23 = arith.constant 0 : index
    %c0_24 = arith.constant 0 : index
    %30 = vector.load %arg8[%c0_23, %c0_24] : memref<16x256xf32, #tpu.memory_space<vmem>>, vector<16x256xf32>
    %cst_25 = arith.constant dense<0.000000e+00> : vector<2x256xf32>
    %31 = tpu.matmul %29, %30, %cst_25 {dimension_numbers = #tpu.dot_dimension_numbers<[1], [0], [0], [1], [0, 0, 1, 1], [], []>} : vector<2x16xf32>, vector<16x256xf32>, vector<2x256xf32> -> vector<2x256xf32>
    %32 = vector.extract_strided_slice %31 {offsets = [0, 0], sizes = [1, 256], strides = [1, 1]} : vector<2x256xf32> to vector<1x256xf32>
    %33 = vector.extract_strided_slice %31 {offsets = [1, 0], sizes = [1, 256], strides = [1, 1]} : vector<2x256xf32> to vector<1x256xf32>
    %34 = arith.mulf %32, %32 : vector<1x256xf32>
    %35 = arith.subf %33, %34 : vector<1x256xf32>
    %cst_26 = arith.constant 9.99999974E-6 : f32
    %36 = vector.broadcast %cst_26 : f32 to vector<1x256xf32>
    %37 = arith.addf %35, %36 : vector<1x256xf32>
    %38 = math.rsqrt %37 : vector<1x256xf32>
    %c0_27 = arith.constant 0 : index
    %c0_28 = arith.constant 0 : index
    %39 = vector.load %arg3[%c0_27, %c0_28] : memref<1x256xf32, #tpu.memory_space<vmem>>, vector<1x256xf32>
    %40 = arith.mulf %39, %38 : vector<1x256xf32>
    %c0_29 = arith.constant 0 : index
    %c0_30 = arith.constant 0 : index
    %41 = vector.load %arg4[%c0_29, %c0_30] : memref<1x256xf32, #tpu.memory_space<vmem>>, vector<1x256xf32>
    %42 = arith.mulf %32, %40 : vector<1x256xf32>
    %43 = arith.subf %41, %42 : vector<1x256xf32>
    %44 = vector.broadcast %40 : vector<1x256xf32> to vector<32x256xf32>
    %45 = arith.mulf %21, %44 : vector<32x256xf32>
    %46 = vector.broadcast %43 : vector<1x256xf32> to vector<32x256xf32>
    %47 = arith.addf %45, %46 : vector<32x256xf32>
    %cst_31 = arith.constant 0.000000e+00 : f32
    %48 = vector.broadcast %cst_31 : f32 to vector<32x256xf32>
    %49 = arith.maximumf %47, %48 : vector<32x256xf32>
    %cst_32 = arith.constant 0.000000e+00 : bf16
    %50 = vector.broadcast %cst_32 : bf16 to vector<2x1x256xbf16>
    %c0_33 = arith.constant 0 : index
    %c0_34 = arith.constant 0 : index
    %c0_35 = arith.constant 0 : index
    %51 = vector.load %arg10[%c0_33, %c0_34, %c0_35] : memref<2x18x256xbf16, #tpu.memory_space<vmem>>, vector<2x1x256xbf16>
    tpu.vector_store %arg10[%c0_33, %c0_34, %c0_35], %50 {strides = array<i32>} : memref<2x18x256xbf16, #tpu.memory_space<vmem>>, vector<2x1x256xbf16>,
    %cst_36 = arith.constant 0.000000e+00 : bf16
    %52 = vector.broadcast %cst_36 : bf16 to vector<2x1x256xbf16>
    %c0_37 = arith.constant 0 : index
    %c17 = arith.constant 17 : index
    %c0_38 = arith.constant 0 : index
    %53 = vector.load %arg10[%c0_37, %c17, %c0_38] : memref<2x18x256xbf16, #tpu.memory_space<vmem>>, vector<2x1x256xbf16>
    tpu.vector_store %arg10[%c0_37, %c17, %c0_38], %52 {strides = array<i32>} : memref<2x18x256xbf16, #tpu.memory_space<vmem>>, vector<2x1x256xbf16>,
    %54 = vector.shape_cast %49 : vector<32x256xf32> to vector<2x16x256xf32>
    %55 = arith.truncf %54 : vector<2x16x256xf32> to vector<2x16x256xbf16>
    %c0_39 = arith.constant 0 : index
    %c1_40 = arith.constant 1 : index
    %c0_41 = arith.constant 0 : index
    %56 = vector.load %arg10[%c0_39, %c1_40, %c0_41] : memref<2x18x256xbf16, #tpu.memory_space<vmem>>, vector<2x16x256xbf16>
    tpu.vector_store %arg10[%c0_39, %c1_40, %c0_41], %55 {strides = array<i32>} : memref<2x18x256xbf16, #tpu.memory_space<vmem>>, vector<2x16x256xbf16>,
    %cst_42 = arith.constant 0.000000e+00 : f32
    %57 = vector.broadcast %cst_42 : f32 to vector<32x256xf32>
    %c0_43 = arith.constant 0 : index
    %c0_44 = arith.constant 0 : index
    %c0_45 = arith.constant 0 : index
    %58 = vector.load %arg10[%c0_43, %c0_44, %c0_45] : memref<2x18x256xbf16, #tpu.memory_space<vmem>>, vector<2x16x256xbf16>
    %59 = vector.shape_cast %58 : vector<2x16x256xbf16> to vector<32x256xbf16>
    %c0_46 = arith.constant 0 : index
    %c0_47 = arith.constant 0 : index
    %c0_48 = arith.constant 0 : index
    %60 = vector.load %arg2[%c0_46, %c0_47, %c0_48] : memref<3x256x256xbf16, #tpu.memory_space<vmem>>, vector<1x256x256xbf16>
    %61 = vector.shape_cast %60 : vector<1x256x256xbf16> to vector<256x256xbf16>
    %cst_49 = arith.constant dense<0.000000e+00> : vector<32x256xf32>
    %62 = tpu.matmul %59, %61, %cst_49 {dimension_numbers = #tpu.dot_dimension_numbers<[1], [0], [0], [1], [0, 0, 1, 1], [], []>} : vector<32x256xbf16>, vector<256x256xbf16>, vector<32x256xf32> -> vector<32x256xf32>
    %63 = arith.addf %57, %62 : vector<32x256xf32>
    %c0_50 = arith.constant 0 : index
    %c1_51 = arith.constant 1 : index
    %c0_52 = arith.constant 0 : index
    %64 = vector.load %arg10[%c0_50, %c1_51, %c0_52] : memref<2x18x256xbf16, #tpu.memory_space<vmem>>, vector<2x16x256xbf16>
    %65 = vector.shape_cast %64 : vector<2x16x256xbf16> to vector<32x256xbf16>
    %c1_53 = arith.constant 1 : index
    %c0_54 = arith.constant 0 : index
    %c0_55 = arith.constant 0 : index
    %66 = vector.load %arg2[%c1_53, %c0_54, %c0_55] : memref<3x256x256xbf16, #tpu.memory_space<vmem>>, vector<1x256x256xbf16>
    %67 = vector.shape_cast %66 : vector<1x256x256xbf16> to vector<256x256xbf16>
    %cst_56 = arith.constant dense<0.000000e+00> : vector<32x256xf32>
    %68 = tpu.matmul %65, %67, %cst_56 {dimension_numbers = #tpu.dot_dimension_numbers<[1], [0], [0], [1], [0, 0, 1, 1], [], []>} : vector<32x256xbf16>, vector<256x256xbf16>, vector<32x256xf32> -> vector<32x256xf32>
    %69 = arith.addf %63, %68 : vector<32x256xf32>
    %c0_57 = arith.constant 0 : index
    %c2_58 = arith.constant 2 : index
    %c0_59 = arith.constant 0 : index
    %70 = vector.load %arg10[%c0_57, %c2_58, %c0_59] : memref<2x18x256xbf16, #tpu.memory_space<vmem>>, vector<2x16x256xbf16>
    %71 = vector.shape_cast %70 : vector<2x16x256xbf16> to vector<32x256xbf16>
    %c2_60 = arith.constant 2 : index
    %c0_61 = arith.constant 0 : index
    %c0_62 = arith.constant 0 : index
    %72 = vector.load %arg2[%c2_60, %c0_61, %c0_62] : memref<3x256x256xbf16, #tpu.memory_space<vmem>>, vector<1x256x256xbf16>
    %73 = vector.shape_cast %72 : vector<1x256x256xbf16> to vector<256x256xbf16>
    %cst_63 = arith.constant dense<0.000000e+00> : vector<32x256xf32>
    %74 = tpu.matmul %71, %73, %cst_63 {dimension_numbers = #tpu.dot_dimension_numbers<[1], [0], [0], [1], [0, 0, 1, 1], [], []>} : vector<32x256xbf16>, vector<256x256xbf16>, vector<32x256xf32> -> vector<32x256xf32>
    %75 = arith.addf %69, %74 : vector<32x256xf32>
    %cst_64 = arith.constant dense<0.000000e+00> : vector<256xf32>
    %76 = vector.multi_reduction <add>, %75, %cst_64 [0] : vector<32x256xf32> to vector<256xf32>
    %77 = vector.shape_cast %76 : vector<256xf32> to vector<1x256xf32>
    %78 = arith.mulf %75, %75 : vector<32x256xf32>
    %cst_65 = arith.constant dense<0.000000e+00> : vector<256xf32>
    %79 = vector.multi_reduction <add>, %78, %cst_65 [0] : vector<32x256xf32> to vector<256xf32>
    %80 = vector.shape_cast %79 : vector<256xf32> to vector<1x256xf32>
    %81 = tpu.concatenate %77, %80 in 0 : vector<1x256xf32>, vector<1x256xf32> -> vector<2x256xf32>
    %c0_66 = arith.constant 0 : index
    %c0_67 = arith.constant 0 : index
    %82 = vector.load %arg7[%c0_66, %c0_67] : memref<256x16xf32, #tpu.memory_space<vmem>>, vector<256x16xf32>
    %cst_68 = arith.constant dense<0.000000e+00> : vector<2x16xf32>
    %83 = tpu.matmul %81, %82, %cst_68 {dimension_numbers = #tpu.dot_dimension_numbers<[1], [0], [0], [1], [0, 0, 1, 1], [], []>} : vector<2x256xf32>, vector<256x16xf32>, vector<2x16xf32> -> vector<2x16xf32>
    %c0_69 = arith.constant 0 : index
    %c0_70 = arith.constant 0 : index
    %84 = vector.load %arg8[%c0_69, %c0_70] : memref<16x256xf32, #tpu.memory_space<vmem>>, vector<16x256xf32>
    %cst_71 = arith.constant dense<0.000000e+00> : vector<2x256xf32>
    %85 = tpu.matmul %83, %84, %cst_71 {dimension_numbers = #tpu.dot_dimension_numbers<[1], [0], [0], [1], [0, 0, 1, 1], [], []>} : vector<2x16xf32>, vector<16x256xf32>, vector<2x256xf32> -> vector<2x256xf32>
    %86 = vector.extract_strided_slice %85 {offsets = [0, 0], sizes = [1, 256], strides = [1, 1]} : vector<2x256xf32> to vector<1x256xf32>
    %87 = vector.extract_strided_slice %85 {offsets = [1, 0], sizes = [1, 256], strides = [1, 1]} : vector<2x256xf32> to vector<1x256xf32>
    %88 = arith.mulf %86, %86 : vector<1x256xf32>
    %89 = arith.subf %87, %88 : vector<1x256xf32>
    %cst_72 = arith.constant 9.99999974E-6 : f32
    %90 = vector.broadcast %cst_72 : f32 to vector<1x256xf32>
    %91 = arith.addf %89, %90 : vector<1x256xf32>
    %92 = math.rsqrt %91 : vector<1x256xf32>
    %c0_73 = arith.constant 0 : index
    %c0_74 = arith.constant 0 : index
    %93 = vector.load %arg5[%c0_73, %c0_74] : memref<1x256xf32, #tpu.memory_space<vmem>>, vector<1x256xf32>
    %94 = arith.mulf %93, %92 : vector<1x256xf32>
    %c0_75 = arith.constant 0 : index
    %c0_76 = arith.constant 0 : index
    %95 = vector.load %arg6[%c0_75, %c0_76] : memref<1x256xf32, #tpu.memory_space<vmem>>, vector<1x256xf32>
    %96 = arith.mulf %86, %94 : vector<1x256xf32>
    %97 = arith.subf %95, %96 : vector<1x256xf32>
    %c0_77 = arith.constant 0 : index
    %c1_78 = arith.constant 1 : index
    %c0_79 = arith.constant 0 : index
    %98 = vector.load %arg0[%c0_77, %c1_78, %c0_79] : memref<2x18x256xf32, #tpu.memory_space<vmem>>, vector<2x16x256xf32>
    %99 = vector.shape_cast %98 : vector<2x16x256xf32> to vector<32x256xf32>
    %100 = vector.broadcast %94 : vector<1x256xf32> to vector<32x256xf32>
    %101 = arith.mulf %75, %100 : vector<32x256xf32>
    %102 = arith.addf %99, %101 : vector<32x256xf32>
    %103 = vector.broadcast %97 : vector<1x256xf32> to vector<32x256xf32>
    %104 = arith.addf %102, %103 : vector<32x256xf32>
    %c0_80 = arith.constant 0 : index
    %c0_81 = arith.constant 0 : index
    %105 = vector.load %arg9[%c0_80, %c0_81] : memref<32x256xf32, #tpu.memory_space<vmem>>, vector<32x256xf32>
    tpu.vector_store %arg9[%c0_80, %c0_81], %104 {strides = array<i32>} : memref<32x256xf32, #tpu.memory_space<vmem>>, vector<32x256xf32>,
    return
  }
}

</mosaic_0001>

<bundles_post_ra>
// kernel: block_forward.1
= control target key start
LH: loop header
LB: loop body
LE: loop exit
PB: predicated region body
PF: predicated region fallthrough
CT: control target
= control target key end

     0   :  { %vm97_vm0 = vcmask 1046528   ;;  %vm605_vm1 = vcmask 1045504   ;;  %vm936_vm2 = vcmask 1040384   ;;  %vm1224_vm3 = vsmask.f32 256  ;;  %s4720_s1 = inlined_call_operand.vmem [shape: bf16[3,256,256], index: 1, kind: input, shape index: {}]   ;;  %s4721_s0 = inlined_call_operand.vmem [shape: f32[2,18,256], index: 0, kind: input, shape index: {}]   ;;  %s4722_s7 = inlined_call_operand.vmem [shape: f32[256,16], index: 7, kind: input, shape index: {}]   ;;  %s4723_s8 = inlined_call_operand.vmem [shape: f32[16,256], index: 8, kind: input, shape index: {}]   ;;  %s4724_s2 = inlined_call_operand.vmem [shape: bf16[3,256,256], index: 2, kind: input, shape index: {}]   ;;  %s4725_s3 = inlined_call_operand.vmem [shape: f32[1,256], index: 3, kind: input, shape index: {}]   ;;  %s4726_s4 = inlined_call_operand.vmem [shape: f32[1,256], index: 4, kind: input, shape index: {}]   ;;  %s4727_s5 = inlined_call_operand.vmem [shape: f32[1,256], index: 5, kind: input, shape index: {}]   ;;  %s4728_s6 = inlined_call_operand.vmem [shape: f32[1,256], index: 6, kind: input, shape index: {}]   ;;  %s4729_s9 = inlined_call_operand.vmem [shape: f32[32,256], index: 9, kind: output, shape index: {}]  }
   0x1   :  { %v3118_v0 = vld [vmem:[%s4720_s1 + $0x104] ss:$8 sps:$4 sm:$0xff]   ;;  %v3120_v1 = vld [vmem:[%s4720_s1 + $0x100] ss:$8 sps:$4 sm:$0xff]   ;;  %v3121_v2 = vld [vmem:[%s4720_s1 + $0x114] ss:$8 sps:$4 sm:$0xff]  }
   0x2   :  { %323 = vmatprep.subr.bf16.mxu0 %v3118_v0  ;;  %v3123_v3 = vld [vmem:[%s4720_s1 + $0x110] ss:$8 sps:$4 sm:$0xff]   ;;  %v3124_v4 = vld [vmem:[%s4720_s1 + $0x124] ss:$8 sps:$4 sm:$0xff]   ;;  %v3126_v5 = vld [vmem:[%s4720_s1 + $0x120] ss:$8 sps:$4 sm:$0xff]  }
   0x3   :  { %324 = vmatpush1.bf16.msra.mxu0 %v3120_v1  ;;  %v3127_v6 = vld [vmem:[%s4720_s1 + $0x134] ss:$8 sps:$4 sm:$0xff]   ;;  %v3129_v7 = vld [vmem:[%s4720_s1 + $0x130] ss:$8 sps:$4 sm:$0xff]   ;;  %v3130_v8 = vld [vmem:[%s4720_s1 + $0x144] ss:$8 sps:$4 sm:$0xff]  }
   0x4   :  { %325 = vmatprep.subr.bf16.mxu0 %v3121_v2  ;;  %v3132_v9 = vld [vmem:[%s4720_s1 + $0x140] ss:$8 sps:$4 sm:$0xff]   ;;  %v3133_v10 = vld [vmem:[%s4720_s1 + $0x154] ss:$8 sps:$4 sm:$0xff]   ;;  %v3135_v11 = vld [vmem:[%s4720_s1 + $0x150] ss:$8 sps:$4 sm:$0xff]  }
   0x5   :  { %v3136_v12 = vld [vmem:[%s4720_s1 + $0x164] ss:$8 sps:$4 sm:$0xff]   ;;  %v3508_v13 = vld [vmem:[%s4721_s0 + $0x18] sm:$0xff]  ;;  %v80_v15 = vld [vmem:[%s4721_s0 + $0x28] sm:$0x1]  ;;  %vm1226_vm4 = vcmask 1044484  }
   0x6   :  { %v78_v14 = vld [vmem:[%s4721_s0 + $0x8] sm:$0xfe]  ;;  %v102_v17 = vrot.slane %v3508_v13, 1  ;;  %v106_v19 = vrot.slane %v80_v15, 1  ;;  %v3139_v20 = vld [vmem:[%s4720_s1 + $0x174] ss:$8 sps:$4 sm:$0xff]   ;;  %vm1225_vm6 = vmand %vm936_vm2, %vm1224_vm3 }
   0x7   :  { %326 = vmatpush1.bf16.msra.mxu0 %v3123_v3  ;;  %v101_v16 = vrot.slane %v78_v14, 1  ;;  %v3138_v18 = vld [vmem:[%s4720_s1 + $0x160] ss:$8 sps:$4 sm:$0xff]   ;;  %v3141_v24 = vld [vmem:[%s4720_s1 + $0x170] ss:$8 sps:$4 sm:$0xff]   ;;  %vm1309_vm13 = vcmask 1043456  }
   0x8   :  { %327 = vmatprep.subr.bf16.mxu0 %v3124_v4  ;;  %v107_v22 = vsel %vm97_vm0, %v102_v17, %v106_v19  ;;  %v3142_v25 = vld [vmem:[%s4720_s1 + $0x184] ss:$8 sps:$4 sm:$0xff]   ;;  %v3144_v26 = vld [vmem:[%s4720_s1 + $0x180] ss:$8 sps:$4 sm:$0xff]   ;;  %v3145_v27 = vld [vmem:[%s4720_s1 + $0x194] ss:$8 sps:$4 sm:$0xff]  }
   0x9   :  { %v103_v21 = vsel %vm97_vm0, %v101_v16, %v102_v17  ;;  %v3147_v28 = vld [vmem:[%s4720_s1 + $0x190] ss:$8 sps:$4 sm:$0xff]   ;;  %v3148_v29 = vld [vmem:[%s4720_s1 + $0x1a4] ss:$8 sps:$4 sm:$0xff]   ;;  %v3150_v30 = vld [vmem:[%s4720_s1 + $0x1a0] ss:$8 sps:$4 sm:$0xff]  }
   0xa   :  { %v127_v23 = vpack.c.bf16 %v107_v22, %v103_v21  ;;  %v3151_v31 = vld [vmem:[%s4720_s1 + $0x1b4] ss:$8 sps:$4 sm:$0xff]   ;;  %v3153_v32 = vld [vmem:[%s4720_s1 + $0x1b0] ss:$8 sps:$4 sm:$0xff]   ;;  %v3154_v33 = vld [vmem:[%s4720_s1 + $0x1c4] ss:$8 sps:$4 sm:$0xff]  }
   0xb   :  { %328 = vmatpush1.bf16.msra.mxu0 %v3126_v5  ;;  %v3156_v34 = vld [vmem:[%s4720_s1 + $0x1c0] ss:$8 sps:$4 sm:$0xff]   ;;  %v3157_v35 = vld [vmem:[%s4720_s1 + $0x1d4] ss:$8 sps:$4 sm:$0xff]   ;;  %v3159_v36 = vld [vmem:[%s4720_s1 + $0x1d0] ss:$8 sps:$4 sm:$0xff]  }
   0xc   :  { %329 = vmatprep.subr.bf16.mxu0 %v3127_v6  ;;  %355 = vmatprep.mubr.bf16.mxu0 %v127_v23  ;;  %v3160_v37 = vld [vmem:[%s4720_s1 + $0x1e4] ss:$8 sps:$4 sm:$0xff]   ;;  %v3570_v38 = vld [vmem:[%s4721_s0 + $0x10] sm:$0xff]  ;;  %v79_v40 = vld [vmem:[%s4721_s0 + $0x20] sm:$0x1]  ;;  %vm1311_vm15 = vcmask 1047556  }
   0xd   :  { %v77_v39 = vld [vmem:[%s4721_s0] sm:$0xfe]  ;;  %v3581_v41 = vld [vmem:[%s4721_s0 + $0x48] sm:$0xff]  ;;  %v82_v42 = vld [vmem:[%s4721_s0 + $0x38] sm:$0xfe]  ;;  %v99_v46 = vrot.slane %v3570_v38, 1 }
   0xe   :  { %v84_v43 = vld [vmem:[%s4721_s0 + $0x58] sm:$0x1]  ;;  %v3162_v44 = vld [vmem:[%s4720_s1 + $0x1e0] ss:$8 sps:$4 sm:$0xff]   ;;  %v98_v45 = vrot.slane %v77_v39, 1  ;;  %v104_v47 = vrot.slane %v79_v40, 1 }
   0xf   :  { %330 = vmatpush1.bf16.msra.mxu0 %v3129_v7  ;;  %v3163_v48 = vld [vmem:[%s4720_s1 + $0x1f4] ss:$8 sps:$4 sm:$0xff]   ;;  %v111_v49 = vrot.slane %v82_v42, 1  ;;  %v112_v50 = vrot.slane %v3581_v41, 1  ;;  %v116_v51 = vrot.slane %v84_v43, 1  ;;  %v3608_v56 = vld [vmem:[%s4721_s0 + $0x40] sm:$0xff] }
  0x10   :  { %331 = vmatprep.subr.bf16.mxu0 %v3130_v8  ;;  %v3165_v52 = vld [vmem:[%s4720_s1 + $0x1f0] ss:$8 sps:$4 sm:$0xff]   ;;  %v3168_v53 = vld [vmem:[%s4720_s1 + $0x4] ss:$8 sps:$4 sm:$0xff]   ;;  %v100_v54 = vsel %vm97_vm0, %v98_v45, %v99_v46  ;;  %v105_v55 = vsel %vm97_vm0, %v99_v46, %v104_v47  ;;  %v3166_v62 = vld [vmem:[%s4720_s1] ss:$8 sps:$4 sm:$0xff]  }
  0x11   :  { %v113_v57 = vsel %vm97_vm0, %v111_v49, %v112_v50  ;;  %v117_v58 = vsel %vm97_vm0, %v112_v50, %v116_v51  ;;  %v81_v59 = vld [vmem:[%s4721_s0 + $0x30] sm:$0xfe]  ;;  %v83_v60 = vld [vmem:[%s4721_s0 + $0x50] sm:$0x1]  ;;  %v126_v61 = vpack.c.bf16 %v105_v55, %v100_v54  ;;  %v109_v1 = vrot.slane %v3608_v56, 1  ;;  %v34_v8 = vld [vmem:[%s4721_s0 + $0x8] sm:$0xff] }
  0x12   :  { %v129_v63 = vpack.c.bf16 %v117_v58, %v113_v57  ;;  %v108_v0 = vrot.slane %v81_v59, 1  ;;  %v114_v2 = vrot.slane %v83_v60, 1  ;;  %v3171_v3 = vld [vmem:[%s4720_s1 + $0x14] ss:$8 sps:$4 sm:$0xff]   ;;  %v3169_v4 = vld [vmem:[%s4720_s1 + $0x10] ss:$8 sps:$4 sm:$0xff]  }
  0x13   :  { %332 = vmatpush1.bf16.msra.mxu0 %v3132_v9  ;;  %v3174_v5 = vld [vmem:[%s4720_s1 + $0x24] ss:$8 sps:$4 sm:$0xff]   ;;  %v3175_v14 = vld [vmem:[%s4720_s1 + $0x30] ss:$8 sps:$4 sm:$0xff]   ;;  %v3178_v22 = vld [vmem:[%s4720_s1 + $0x40] ss:$8 sps:$4 sm:$0xff]  }
  0x14   :  { %333 = vmatprep.subr.bf16.mxu0 %v3133_v10  ;;  %v110_v6 = vsel %vm97_vm0, %v108_v0, %v109_v1  ;;  %v115_v7 = vsel %vm97_vm0, %v109_v1, %v114_v2  ;;  %v3172_v10 = vld [vmem:[%s4720_s1 + $0x20] ss:$8 sps:$4 sm:$0xff]   ;;  %v3183_v23 = vld [vmem:[%s4720_s1 + $0x54] ss:$8 sps:$4 sm:$0xff]   ;;  %v3205_v42 = vld [vmem:[%s4720_s1 + $0xd0] ss:$8 sps:$4 sm:$0xff]  }
  0x15   :  { %v128_v9 = vpack.c.bf16 %v115_v7, %v110_v6  ;;  %v955_v15 = vld [vmem:[%s4722_s7 + $0x80] sm:$0xff]  ;;  %v956_v16 = vld [vmem:[%s4722_s7 + $0x88] sm:$0xff]  ;;  %v3207_v40 = vld [vmem:[%s4720_s1 + $0xd4] ss:$8 sps:$4 sm:$0xff]   ;;  %v610_v58 = vrot.slane %v3508_v13, 2 }
  0x16   :  { %v939_v17 = vld [vmem:[%s4722_s7] sm:$0xff]  ;;  %v3012_v19 = vpack.c.bf16 %v956_v16, %v955_v15  ;;  %v3213_v45 = vld [vmem:[%s4720_s1 + $0xf4] ss:$8 sps:$4 sm:$0xff]   ;;  %v3211_v46 = vld [vmem:[%s4720_s1 + $0xf0] ss:$8 sps:$4 sm:$0xff]  }
  0x17   :  { %334 = vmatpush1.bf16.msra.mxu0 %v3135_v11  ;;  %v42_v11 = vpack.c.bf16 %v3508_v13, %v34_v8  ;;  %v3202_v39 = vld [vmem:[%s4720_s1 + $0xc0] ss:$8 sps:$4 sm:$0xff]   ;;  %v3210_v43 = vld [vmem:[%s4720_s1 + $0xe4] ss:$8 sps:$4 sm:$0xff]   ;;  %v38_v49 = vld [vmem:[%s4721_s0 + $0x38] sm:$0xff] }
  0x18   :  { %335 = vmatprep.subr.bf16.mxu0 %v3136_v12  ;;  %v3177_v12 = vld [vmem:[%s4720_s1 + $0x34] ss:$8 sps:$4 sm:$0xff]   ;;  %3013 = vmatprep.subr.bf16.mxu1 %v3012_v19  ;;  %v33_v47 = vld [vmem:[%s4721_s0] sm:$0xff]  ;;  %v590_v50 = vld [vmem:[%s4721_s0 + $0x8] sm:$0xfc]  ;;  %v44_v54 = vpack.c.bf16 %v3581_v41, %v38_v49  ;;  %v617_v49 = vrot.slane %v3608_v56, 2 }
  0x19   :  { %v592_v51 = vld [vmem:[%s4721_s0 + $0x28] sm:$0x3]  ;;  %v3219_v55 = vld [vmem:[%s4720_s1 + $0x214] ss:$8 sps:$4 sm:$0xff]   ;;  %v609_v57 = vrot.slane %v590_v50, 2 }
  0x1a   :  { %v614_v59 = vrot.slane %v592_v51, 2  ;;  %v3217_v60 = vld [vmem:[%s4720_s1 + $0x210] ss:$8 sps:$4 sm:$0xff]   ;;  %v3220_v1 = vld [vmem:[%s4720_s1 + $0x220] ss:$8 sps:$4 sm:$0xff]  }
  0x1b   :  { %336 = vmatpush1.bf16.msra.mxu0 %v3138_v18  ;;  %v3180_v18 = vld [vmem:[%s4720_s1 + $0x44] ss:$8 sps:$4 sm:$0xff]   ;;  %v611_v13 = vsel %vm605_vm1, %v609_v57, %v610_v58  ;;  %v3226_v6 = vld [vmem:[%s4720_s1 + $0x240] ss:$8 sps:$4 sm:$0xff]   ;;  %v3231_v7 = vld [vmem:[%s4720_s1 + $0x254] ss:$8 sps:$4 sm:$0xff]  }
  0x1c   :  { %337 = vmatprep.subr.bf16.mxu0 %v3139_v20  ;;  %v940_v20 = vld [vmem:[%s4722_s7 + $0x8] sm:$0xff]  ;;  %v3229_v8 = vld [vmem:[%s4720_s1 + $0x250] ss:$8 sps:$4 sm:$0xff]   ;;  %v3243_v16 = vld [vmem:[%s4720_s1 + $0x294] ss:$8 sps:$4 sm:$0xff]  }
  0x1d   :  { %v3014_v21 = vpack.c.bf16 %v940_v20, %v939_v17  ;;  %v3238_v15 = vld [vmem:[%s4720_s1 + $0x280] ss:$8 sps:$4 sm:$0xff]   ;;  %v3241_v17 = vld [vmem:[%s4720_s1 + $0x290] ss:$8 sps:$4 sm:$0xff]   ;;  %v3249_v20 = vld [vmem:[%s4720_s1 + $0x2b4] ss:$8 sps:$4 sm:$0xff]  }
  0x1e   :  { %v3244_v19 = vld [vmem:[%s4720_s1 + $0x2a0] ss:$8 sps:$4 sm:$0xff]   ;;  %vm1227_vm5 = vsmask.f32 4352  ;;  %vm1236_vm7 = vsmask.f32 7938 }
  0x1f   :  { %338 = vmatpush1.bf16.msra.mxu0 %v3141_v24  ;;  %3015 = vmatpush3.bf16.msra.mxu1 %v3014_v21  ;;  %v3181_v24 = vld [vmem:[%s4720_s1 + $0x50] ss:$8 sps:$4 sm:$0xff]   ;;  %vm1228_vm8 = vmand %vm1226_vm4, %vm1227_vm5  ;;  %vm1238_vm9 = vsmask.f32 7954 }
  0x20   :  { %339 = vmatprep.subr.bf16.mxu0 %v3142_v25  ;;  %v3186_v25 = vld [vmem:[%s4720_s1 + $0x64] ss:$8 sps:$4 sm:$0xff]   ;;  %v3247_v21 = vld [vmem:[%s4720_s1 + $0x2b0] ss:$8 sps:$4 sm:$0xff]   ;;  %vm3961_vm10 = vmor %vm1228_vm8, %vm1225_vm6  ;;  %vm1045_vm6 = vcmask 130048  }
  0x21   :  { %vm1237_vm11 = vmand %vm936_vm2, %vm1236_vm7  ;;  %vm1366_vm8 = vsmask.f32 3328 }
  0x22   :  { %vm1239_vm12 = vmand %vm1226_vm4, %vm1238_vm9 }
  0x23   :  { %340 = vmatpush1.bf16.msra.mxu0 %v3144_v26  ;;  %v3184_v26 = vld [vmem:[%s4720_s1 + $0x60] ss:$8 sps:$4 sm:$0xff]   ;;  %vm1240_vm14 = vmor %vm1239_vm12, %vm1237_vm11  ;;  %vm1918_vm12 = vcmask 1042432  }
  0x24   :  { %341 = vmatprep.subr.bf16.mxu0 %v3145_v27  ;;  %v3189_v27 = vld [vmem:[%s4720_s1 + $0x74] ss:$8 sps:$4 sm:$0xff]   ;;  %vm3985_vm5 = vmand %vm1311_vm15, %vm1238_vm9  ;;  %vm1367_vm9 = vsmask.f32 7440 }
  0x27   :  { %342 = vmatpush1.bf16.msra.mxu0 %v3147_v28  ;;  %v3187_v28 = vld [vmem:[%s4720_s1 + $0x70] ss:$8 sps:$4 sm:$0xff]  }
  0x28   :  { %343 = vmatprep.subr.bf16.mxu0 %v3148_v29  ;;  %v3192_v29 = vld [vmem:[%s4720_s1 + $0x84] ss:$8 sps:$4 sm:$0xff]  }
  0x2b   :  { %344 = vmatpush1.bf16.msra.mxu0 %v3150_v30  ;;  %v3190_v30 = vld [vmem:[%s4720_s1 + $0x80] ss:$8 sps:$4 sm:$0xff]  }
  0x2c   :  { %345 = vmatprep.subr.bf16.mxu0 %v3151_v31  ;;  %v3195_v31 = vld [vmem:[%s4720_s1 + $0x94] ss:$8 sps:$4 sm:$0xff]  }
  0x2f   :  { %346 = vmatpush1.bf16.msra.mxu0 %v3153_v32  ;;  %v3193_v32 = vld [vmem:[%s4720_s1 + $0x90] ss:$8 sps:$4 sm:$0xff]  }
  0x30   :  { %347 = vmatprep.subr.bf16.mxu0 %v3154_v33  ;;  %v3198_v33 = vld [vmem:[%s4720_s1 + $0xa4] ss:$8 sps:$4 sm:$0xff]  }
  0x33   :  { %348 = vmatpush1.bf16.msra.mxu0 %v3156_v34  ;;  %v3196_v34 = vld [vmem:[%s4720_s1 + $0xa0] ss:$8 sps:$4 sm:$0xff]  }
  0x34   :  { %349 = vmatprep.subr.bf16.mxu0 %v3157_v35  ;;  %v3201_v35 = vld [vmem:[%s4720_s1 + $0xb4] ss:$8 sps:$4 sm:$0xff]  }
  0x37   :  { %350 = vmatpush1.bf16.msra.mxu0 %v3159_v36  ;;  %v3199_v36 = vld [vmem:[%s4720_s1 + $0xb0] ss:$8 sps:$4 sm:$0xff]  }
  0x38   :  { %351 = vmatprep.subr.bf16.mxu0 %v3160_v37  ;;  %v3204_v37 = vld [vmem:[%s4720_s1 + $0xc4] ss:$8 sps:$4 sm:$0xff]  }
  0x3b   :  { %352 = vmatpush1.bf16.msra.mxu0 %v3162_v44  ;;  %v3208_v44 = vld [vmem:[%s4720_s1 + $0xe0] ss:$8 sps:$4 sm:$0xff]  }
  0x3c   :  { %353 = vmatprep.subr.bf16.mxu0 %v3163_v48  ;;  %v3216_v48 = vld [vmem:[%s4720_s1 + $0x204] ss:$8 sps:$4 sm:$0xff]  }
  0x3f   :  { %354 = vmatpush1.bf16.msra.mxu0 %v3165_v52  ;;  %v41_v52 = vpack.c.bf16 %v3570_v38, %v33_v47 }
  0x40   :  { %536 = vmatprep.subr.bf16.mxu0 %v3168_v53  ;;  %v3214_v53 = vld [vmem:[%s4720_s1 + $0x200] ss:$8 sps:$4 sm:$0xff]  }
  0x42   :  { %356 = vmatmul.mubr.bf16.vlgmr.msra.gmra.mrb[0].mxu0 %v126_v61  ;;  %v37_v61 = vld [vmem:[%s4721_s0 + $0x30] sm:$0xff] }
  0x43   :  { %537 = vmatpush1.bf16.msra.mxu0 %v3166_v62  ;;  %365 = vmatprep.mubr.bf16.mxu0 %v129_v63  ;;  %v3222_v62 = vld [vmem:[%s4720_s1 + $0x224] ss:$8 sps:$4 sm:$0xff]   ;;  %v615_v63 = vsel %vm605_vm1, %v610_v58, %v614_v59  ;;  %v43_v0 = vpack.c.bf16 %v3608_v56, %v37_v61  ;;  %v941_v56 = vld [vmem:[%s4722_s7 + $0x10] sm:$0xff]  ;;  %v942_v58 = vld [vmem:[%s4722_s7 + $0x18] sm:$0xff] }
  0x44   :  { %538 = vmatprep.subr.bf16.mxu0 %v3171_v3  ;;  %v635_v2 = vpack.c.bf16 %v615_v63, %v611_v13  ;;  %v3225_v3 = vld [vmem:[%s4720_s1 + $0x234] ss:$8 sps:$4 sm:$0xff]   ;;  %v3018_v59 = vpack.c.bf16 %v942_v58, %v941_v56  ;;  %v960_v61 = vld [vmem:[%s4722_s7 + $0xa8] sm:$0xff]  ;;  %v943_v13 = vld [vmem:[%s4722_s7 + $0x20] sm:$0xff] }
  0x45   :  { %v944_v63 = vld [vmem:[%s4722_s7 + $0x28] sm:$0xff] }
  0x47   :  { %539 = vmatpush1.bf16.msra.mxu0 %v3169_v4  ;;  %v3223_v4 = vld [vmem:[%s4720_s1 + $0x230] ss:$8 sps:$4 sm:$0xff]  }
  0x48   :  { %540 = vmatprep.subr.bf16.mxu0 %v3174_v5  ;;  %v3228_v5 = vld [vmem:[%s4720_s1 + $0x244] ss:$8 sps:$4 sm:$0xff]  }
  0x4a   :  { %366 = vmatmul.mubr.bf16.gmra.mrb[4].mxu0 %v128_v9  ;;  %v3234_v9 = vld [vmem:[%s4720_s1 + $0x264] ss:$8 sps:$4 sm:$0xff]  }
  0x4b   :  { %541 = vmatpush1.bf16.msra.mxu0 %v3172_v10  ;;  %568 = vmatprep.mubr.bf16.mxu0 %v42_v11  ;;  %v3232_v10 = vld [vmem:[%s4720_s1 + $0x260] ss:$8 sps:$4 sm:$0xff]   ;;  %v3237_v11 = vld [vmem:[%s4720_s1 + $0x274] ss:$8 sps:$4 sm:$0xff]  }
  0x4c   :  { %542 = vmatprep.subr.bf16.mxu0 %v3177_v12  ;;  %v3235_v12 = vld [vmem:[%s4720_s1 + $0x270] ss:$8 sps:$4 sm:$0xff]  }
  0x4f   :  { %543 = vmatpush1.bf16.msra.mxu0 %v3175_v14  ;;  %v3240_v14 = vld [vmem:[%s4720_s1 + $0x284] ss:$8 sps:$4 sm:$0xff]  }
  0x50   :  { %544 = vmatprep.subr.bf16.mxu0 %v3180_v18  ;;  %v3246_v18 = vld [vmem:[%s4720_s1 + $0x2a4] ss:$8 sps:$4 sm:$0xff]  }
  0x53   :  { %545 = vmatpush1.bf16.msra.mxu0 %v3178_v22  ;;  %v3252_v22 = vld [vmem:[%s4720_s1 + $0x2c4] ss:$8 sps:$4 sm:$0xff]  }
  0x54   :  { %546 = vmatprep.subr.bf16.mxu0 %v3183_v23  ;;  %v3250_v23 = vld [vmem:[%s4720_s1 + $0x2c0] ss:$8 sps:$4 sm:$0xff]  }
  0x57   :  { %547 = vmatpush1.bf16.msra.mxu0 %v3181_v24  ;;  %v3255_v24 = vld [vmem:[%s4720_s1 + $0x2d4] ss:$8 sps:$4 sm:$0xff]  }
  0x58   :  { %548 = vmatprep.subr.bf16.mxu0 %v3186_v25  ;;  %v3253_v25 = vld [vmem:[%s4720_s1 + $0x2d0] ss:$8 sps:$4 sm:$0xff]  }
  0x5b   :  { %549 = vmatpush1.bf16.msra.mxu0 %v3184_v26  ;;  %v3258_v26 = vld [vmem:[%s4720_s1 + $0x2e4] ss:$8 sps:$4 sm:$0xff]  }
  0x5c   :  { %550 = vmatprep.subr.bf16.mxu0 %v3189_v27  ;;  %v589_v27 = vld [vmem:[%s4721_s0] sm:$0xfc] }
  0x5f   :  { %551 = vmatpush1.bf16.msra.mxu0 %v3187_v28  ;;  %v591_v28 = vld [vmem:[%s4721_s0 + $0x20] sm:$0x3] }
  0x60   :  { %552 = vmatprep.subr.bf16.mxu0 %v3192_v29  ;;  %v594_v29 = vld [vmem:[%s4721_s0 + $0x38] sm:$0xfc] }
  0x63   :  { %553 = vmatpush1.bf16.msra.mxu0 %v3190_v30  ;;  %v596_v30 = vld [vmem:[%s4721_s0 + $0x58] sm:$0x3] }
  0x64   :  { %554 = vmatprep.subr.bf16.mxu0 %v3195_v31  ;;  %v607_v31 = vrot.slane %v3570_v38, 2  ;;  %v3259_v38 = vld [vmem:[%s4720_s1 + $0x2f0] ss:$8 sps:$4 sm:$0xff]  }
  0x67   :  { %555 = vmatpush1.bf16.msra.mxu0 %v3193_v32  ;;  %v3256_v32 = vld [vmem:[%s4720_s1 + $0x2e0] ss:$8 sps:$4 sm:$0xff]  }
  0x68   :  { %556 = vmatprep.subr.bf16.mxu0 %v3198_v33  ;;  %v606_v33 = vrot.slane %v589_v27, 2 }
  0x6b   :  { %557 = vmatpush1.bf16.msra.mxu0 %v3196_v34  ;;  %v612_v34 = vrot.slane %v591_v28, 2 }
  0x6c   :  { %558 = vmatprep.subr.bf16.mxu0 %v3201_v35  ;;  %v3261_v35 = vld [vmem:[%s4720_s1 + $0x2f4] ss:$8 sps:$4 sm:$0xff]  }
  0x6f   :  { %559 = vmatpush1.bf16.msra.mxu0 %v3199_v36  ;;  %v619_v36 = vrot.slane %v594_v29, 2  ;;  %v953_v29 = vld [vmem:[%s4722_s7 + $0x70] sm:$0xff] }
  0x70   :  { %560 = vmatprep.subr.bf16.mxu0 %v3204_v37  ;;  %v620_v37 = vrot.slane %v3581_v41, 2  ;;  %v595_v41 = vld [vmem:[%s4721_s0 + $0x50] sm:$0x3] }
  0x71   :  { %v622_v50 = vrot.slane %v595_v41, 2 }
  0x73   :  { %561 = vmatpush1.bf16.msra.mxu0 %v3202_v39  ;;  %v624_v39 = vrot.slane %v596_v30, 2  ;;  %v954_v30 = vld [vmem:[%s4722_s7 + $0x78] sm:$0xff] }
  0x74   :  { %562 = vmatprep.subr.bf16.mxu0 %v3207_v40  ;;  %v608_v40 = vsel %vm605_vm1, %v606_v33, %v607_v31  ;;  %v1233_v33 = vld [vmem:[#allocation2 + $0x18] sm:$0x11] }
  0x77   :  { %563 = vmatpush1.bf16.msra.mxu0 %v3205_v42  ;;  %v613_v42 = vsel %vm605_vm1, %v607_v31, %v612_v34  ;;  %v3042_v31 = vpack.c.bf16 %v954_v30, %v953_v29 }
  0x78   :  { %564 = vmatprep.subr.bf16.mxu0 %v3210_v43  ;;  %v621_v43 = vsel %vm605_vm1, %v619_v36, %v620_v37  ;;  %v1044_v36 = vld [vmem:[%s4723_s8 + $0x18] sm:$0xff] }
  0x7b   :  { %565 = vmatpush1.bf16.msra.mxu0 %v3208_v44  ;;  %v625_v44 = vsel %vm605_vm1, %v620_v37, %v624_v39  ;;  %v1234_v39 = vsel %vm3961_vm10, 0, %v1233_v33 }
  0x7c   :  { %566 = vmatprep.subr.bf16.mxu0 %v3213_v45  ;;  %v593_v45 = vld [vmem:[%s4721_s0 + $0x30] sm:$0xfc]  ;;  %v637_v47 = vpack.c.bf16 %v625_v44, %v621_v43  ;;  %1235 = vst [vmem:[#allocation2 + $0x18] sm:$0x11] %v1234_v39 }
  0x7d   :  { %v1043_v39 = vld [vmem:[%s4723_s8 + $0x10] sm:$0xff] }
  0x7f   :  { %567 = vmatpush1.bf16.msra.mxu0 %v3211_v46  ;;  %v634_v46 = vpack.c.bf16 %v613_v42, %v608_v40  ;;  %v1244_v40 = vld [vmem:[#allocation2 + $0x28] sm:$0x11] }
  0x80   :  { %831 = vmatprep.subr.bf16.mxu0 %v3216_v48  ;;  %v616_v48 = vrot.slane %v593_v45, 2  ;;  %v1245_v44 = vsel %vm1240_vm14, 0, %v1244_v40  ;;  %v3414_v40 = vmov 0.0  }
  0x81   :  { %1246 = vst [vmem:[#allocation2 + $0x28] sm:$0x11] %v1245_v44 }
  0x82   :  { %569 = vmatmul.mubr.bf16.vlgmr.msra.gmra.mrb[0].mxu0 %v41_v52  ;;  %v618_v51 = vsel %vm605_vm1, %v616_v48, %v617_v49  ;;  %v623_v52 = vsel %vm605_vm1, %v617_v49, %v622_v50  ;;  %vm3980_vm1 = vmand %vm1309_vm13, %vm1236_vm7  ;;  %vm1267_vm7 = vsmask.f32 4368 }
  0x83   :  { %832 = vmatpush1.bf16.msra.mxu0 %v3214_v53  ;;  %578 = vmatprep.mubr.bf16.mxu0 %v44_v54  ;;  %v636_v53 = vpack.c.bf16 %v623_v52, %v618_v51  ;;  %v957_v54 = vld [vmem:[%s4722_s7 + $0x90] sm:$0xff]  ;;  %vm1313_vm4 = vmor %vm3985_vm5, %vm3980_vm1 }
  0x84   :  { %833 = vmatprep.subr.bf16.mxu0 %v3219_v55  ;;  %v958_v55 = vld [vmem:[%s4722_s7 + $0x98] sm:$0xff]  ;;  %vm4171_vm11 = vmor %vm1224_vm3, %vm1267_vm7  ;;  %vm1919_vm3 = vcmask 1046532  }
  0x85   :  { %v3016_v57 = vpack.c.bf16 %v958_v55, %v957_v54  ;;  %vm4228_vm13 = vmor %vm1918_vm12, %vm1919_vm3 }
  0x87   :  { %834 = vmatpush1.bf16.msra.mxu0 %v3217_v60  ;;  %3017 = vmatprep.subr.bf16.mxu1 %v3016_v57  ;;  %v959_v60 = vld [vmem:[%s4722_s7 + $0xa0] sm:$0xff] }
  0x88   :  { %835 = vmatprep.subr.bf16.mxu0 %v3222_v62  ;;  %3019 = vmatpush3.bf16.msra.mxu1 %v3018_v59  ;;  %v3020_v62 = vpack.c.bf16 %v960_v61, %v959_v60 }
  0x8a   :  { %579 = vmatmul.mubr.bf16.gmra.mrb[4].mxu0 %v43_v0  ;;  %v3022_v0 = vpack.c.bf16 %v944_v63, %v943_v13  ;;  %3021 = vmatprep.subr.bf16.mxu1 %v3020_v62 }
  0x8b   :  { %836 = vmatpush1.bf16.msra.mxu0 %v3220_v1  ;;  %863 = vmatprep.mubr.bf16.mxu0 %v635_v2  ;;  %v961_v1 = vld [vmem:[%s4722_s7 + $0xb0] sm:$0xff]  ;;  %v962_v2 = vld [vmem:[%s4722_s7 + $0xb8] sm:$0xff] }
  0x8c   :  { %837 = vmatprep.subr.bf16.mxu0 %v3225_v3  ;;  %3023 = vmatpush3.bf16.msra.mxu1 %v3022_v0  ;;  %v3024_v3 = vpack.c.bf16 %v962_v2, %v961_v1 }
  0x8e   :  { %3025 = vmatprep.subr.bf16.mxu1 %v3024_v3 }
  0x8f   :  { %838 = vmatpush1.bf16.msra.mxu0 %v3223_v4  ;;  %v945_v4 = vld [vmem:[%s4722_s7 + $0x30] sm:$0xff] }
  0x90   :  { %839 = vmatprep.subr.bf16.mxu0 %v3228_v5  ;;  %v946_v5 = vld [vmem:[%s4722_s7 + $0x38] sm:$0xff] }
  0x93   :  { %840 = vmatpush1.bf16.msra.mxu0 %v3226_v6  ;;  %v3026_v6 = vpack.c.bf16 %v946_v5, %v945_v4 }
  0x94   :  { %841 = vmatprep.subr.bf16.mxu0 %v3231_v7  ;;  %v963_v7 = vld [vmem:[%s4722_s7 + $0xc0] sm:$0xff] }
  0x95   :  { %3027 = vmatpush3.bf16.msra.mxu1 %v3026_v6 }
  0x97   :  { %842 = vmatpush1.bf16.msra.mxu0 %v3229_v8  ;;  %v964_v8 = vld [vmem:[%s4722_s7 + $0xc8] sm:$0xff] }
  0x98   :  { %843 = vmatprep.subr.bf16.mxu0 %v3234_v9  ;;  %v3028_v9 = vpack.c.bf16 %v964_v8, %v963_v7 }
  0x9a   :  { %3029 = vmatprep.subr.bf16.mxu1 %v3028_v9 }
  0x9b   :  { %844 = vmatpush1.bf16.msra.mxu0 %v3232_v10  ;;  %v947_v10 = vld [vmem:[%s4722_s7 + $0x40] sm:$0xff] }
  0x9c   :  { %845 = vmatprep.subr.bf16.mxu0 %v3237_v11  ;;  %v948_v11 = vld [vmem:[%s4722_s7 + $0x48] sm:$0xff] }
  0x9f   :  { %846 = vmatpush1.bf16.msra.mxu0 %v3235_v12  ;;  %v3030_v12 = vpack.c.bf16 %v948_v11, %v947_v10 }
  0xa0   :  { %847 = vmatprep.subr.bf16.mxu0 %v3240_v14  ;;  %v965_v14 = vld [vmem:[%s4722_s7 + $0xd0] sm:$0xff] }
  0xa1   :  { %3031 = vmatpush3.bf16.msra.mxu1 %v3030_v12 }
  0xa3   :  { %848 = vmatpush1.bf16.msra.mxu0 %v3238_v15  ;;  %v966_v15 = vld [vmem:[%s4722_s7 + $0xd8] sm:$0xff] }
  0xa4   :  { %849 = vmatprep.subr.bf16.mxu0 %v3243_v16  ;;  %v3032_v16 = vpack.c.bf16 %v966_v15, %v965_v14 }
  0xa6   :  { %3033 = vmatprep.subr.bf16.mxu1 %v3032_v16 }
  0xa7   :  { %850 = vmatpush1.bf16.msra.mxu0 %v3241_v17  ;;  %v949_v17 = vld [vmem:[%s4722_s7 + $0x50] sm:$0xff] }
  0xa8   :  { %851 = vmatprep.subr.bf16.mxu0 %v3246_v18  ;;  %v950_v18 = vld [vmem:[%s4722_s7 + $0x58] sm:$0xff] }
  0xab   :  { %852 = vmatpush1.bf16.msra.mxu0 %v3244_v19  ;;  %v3034_v19 = vpack.c.bf16 %v950_v18, %v949_v17 }
  0xac   :  { %853 = vmatprep.subr.bf16.mxu0 %v3249_v20  ;;  %v967_v20 = vld [vmem:[%s4722_s7 + $0xe0] sm:$0xff] }
  0xad   :  { %3035 = vmatpush3.bf16.msra.mxu1 %v3034_v19 }
  0xaf   :  { %854 = vmatpush1.bf16.msra.mxu0 %v3247_v21  ;;  %v968_v21 = vld [vmem:[%s4722_s7 + $0xe8] sm:$0xff] }
  0xb0   :  { %855 = vmatprep.subr.bf16.mxu0 %v3252_v22  ;;  %v951_v22 = vld [vmem:[%s4722_s7 + $0x60] sm:$0xff] }
  0xb3   :  { %856 = vmatpush1.bf16.msra.mxu0 %v3250_v23  ;;  %v3036_v23 = vpack.c.bf16 %v968_v21, %v967_v20 }
  0xb4   :  { %857 = vmatprep.subr.bf16.mxu0 %v3255_v24  ;;  %v952_v24 = vld [vmem:[%s4722_s7 + $0x68] sm:$0xff] }
  0xb5   :  { %v3038_v27 = vpack.c.bf16 %v952_v24, %v951_v22  ;;  %3037 = vmatprep.subr.bf16.mxu1 %v3036_v23 }
  0xb7   :  { %858 = vmatpush1.bf16.msra.mxu0 %v3253_v25  ;;  %v969_v25 = vld [vmem:[%s4722_s7 + $0xf0] sm:$0xff]  ;;  %3039 = vmatpush3.bf16.msra.mxu1 %v3038_v27 }
  0xb8   :  { %859 = vmatprep.subr.bf16.mxu0 %v3258_v26  ;;  %v970_v26 = vld [vmem:[%s4722_s7 + $0xf8] sm:$0xff] }
  0xb9   :  { %v3040_v28 = vpack.c.bf16 %v970_v26, %v969_v25 }
  0xbb   :  { %860 = vmatpush1.bf16.msra.mxu0 %v3256_v32  ;;  %3041 = vmatprep.subr.bf16.mxu1 %v3040_v28  ;;  %v1230_v32 = vld [vmem:[#allocation2] sm:$0x11] }
  0xbc   :  { %861 = vmatprep.subr.bf16.mxu0 %v3261_v35  ;;  %3043 = vmatpush3.bf16.msra.mxu1 %v3042_v31  ;;  %v1042_v35 = vld [vmem:[%s4723_s8 + $0x8] sm:$0xff]  ;;  %v1231_v37 = vsel %vm3961_vm10, 0, %v1230_v32 }
  0xbd   :  { %v3044_v42 = vpack.c.bf16 %v1044_v36, %v1042_v35  ;;  %1232 = vst [vmem:[#allocation2] sm:$0x11] %v1231_v37  ;;  %v1041_v37 = vld [vmem:[%s4723_s8] sm:$0xff] }
  0xbf   :  { %862 = vmatpush1.bf16.msra.mxu0 %v3259_v38  ;;  %v1241_v38 = vld [vmem:[#allocation2 + $0x10] sm:$0x11]  ;;  %3045 = vmatprep.subr.bf16.mxu1 %v3044_v42 }
  0xc0   :  { %v1242_v43 = vsel %vm1240_vm14, 0, %v1241_v38  ;;  %v3046_v38 = vpack.c.bf16 %v1043_v39, %v1041_v37 }
  0xc1   :  { %1243 = vst [vmem:[#allocation2 + $0x10] sm:$0x11] %v1242_v43 }
  0xc2   :  { %864 = vmatmul.mubr.bf16.vlgmr.msra.gmra.mrb[0].mxu0 %v634_v46 }
  0xc3   :  { %873 = vmatprep.mubr.bf16.mxu0 %v637_v47 }
  0xca   :  { %874 = vmatmul.mubr.bf16.gmra.mrb[4].mxu0 %v636_v53 }
 0x195   :  { %v3993_v46 = vpop.f32.mrb[0].mxu0 }
 0x196   :  { %v3995_v47 = vpop.f32.mrb[1].mxu0  ;;  %v910_v49 = vmul.f32 %v3993_v46, %v3993_v46 }
 0x197   :  { %v3997_v48 = vpop.f32.mrb[2].mxu0  ;;  %v911_v53 = vmul.f32 %v3995_v47, %v3995_v47 }
 0x198   :  { %v892_v50 = vadd.f32 %v3997_v48, %v3993_v46  ;;  %v912_v51 = vmul.f32 %v3997_v48, %v3997_v48  ;;  %v4005_v52 = vpop.f32.mrb[3].mxu0 }
 0x199   :  { %v901_v54 = vadd.f32 %v4005_v52, %v3995_v47  ;;  %v913_v55 = vmul.f32 %v4005_v52, %v4005_v52 }
 0x19a   :  { %v918_v57 = vadd.f32 %v912_v51, %v910_v49  ;;  %v3264_v49 = vld [vmem:[%s4724_s2 + $0x104] ss:$8 sps:$4 sm:$0xff]   ;;  %v3267_v51 = vld [vmem:[%s4724_s2 + $0x114] ss:$8 sps:$4 sm:$0xff]  }
 0x19b   :  { %v927_v56 = vadd.f32 %v913_v55, %v911_v53  ;;  %v3265_v53 = vld [vmem:[%s4724_s2 + $0x110] ss:$8 sps:$4 sm:$0xff]   ;;  %v3268_v55 = vld [vmem:[%s4724_s2 + $0x120] ss:$8 sps:$4 sm:$0xff]  }
 0x19d   :  { %v4013_v58 = vpop.f32.mrb[4].mxu0 }
 0x19e   :  { %v893_v59 = vadd.f32 %v892_v50, %v4013_v58  ;;  %v914_v60 = vmul.f32 %v4013_v58, %v4013_v58  ;;  %v4018_v61 = vpop.f32.mrb[5].mxu0  ;;  %v3262_v50 = vld [vmem:[%s4724_s2 + $0x100] ss:$8 sps:$4 sm:$0xff]  }
 0x19f   :  { %v902_v62 = vadd.f32 %v901_v54, %v4018_v61  ;;  %v915_v13 = vmul.f32 %v4018_v61, %v4018_v61  ;;  %v4023_v63 = vpop.f32.mrb[6].mxu0  ;;  %v3270_v54 = vld [vmem:[%s4724_s2 + $0x124] ss:$8 sps:$4 sm:$0xff]  }
 0x1a0   :  { %v919_v0 = vadd.f32 %v918_v57, %v914_v60  ;;  %v894_v1 = vadd.f32 %v893_v59, %v4023_v63  ;;  %v916_v2 = vmul.f32 %v4023_v63, %v4023_v63  ;;  %v4028_v3 = vpop.f32.mrb[7].mxu0  ;;  %v3273_v57 = vld [vmem:[%s4724_s2 + $0x134] ss:$8 sps:$4 sm:$0xff]   ;;  %v3276_v59 = vld [vmem:[%s4724_s2 + $0x144] ss:$8 sps:$4 sm:$0xff]  }
 0x1a1   :  { %v928_v4 = vadd.f32 %v927_v56, %v915_v13  ;;  %v903_v5 = vadd.f32 %v902_v62, %v4028_v3  ;;  %v917_v6 = vmul.f32 %v4028_v3, %v4028_v3  ;;  %v3271_v56 = vld [vmem:[%s4724_s2 + $0x130] ss:$8 sps:$4 sm:$0xff]   ;;  %v3274_v60 = vld [vmem:[%s4724_s2 + $0x140] ss:$8 sps:$4 sm:$0xff]   ;;  %v3279_v62 = vld [vmem:[%s4724_s2 + $0x154] ss:$8 sps:$4 sm:$0xff]  }
 0x1a2   :  { %v895_v7 = vrot.slane %v894_v1, 4  ;;  %v920_v8 = vadd.f32 %v919_v0, %v916_v2  ;;  %v3277_v13 = vld [vmem:[%s4724_s2 + $0x150] ss:$8 sps:$4 sm:$0xff]   ;;  %v3282_v0 = vld [vmem:[%s4724_s2 + $0x164] ss:$8 sps:$4 sm:$0xff]  }
 0x1a3   :  { %v904_v9 = vrot.slane %v903_v5, 4  ;;  %v929_v10 = vadd.f32 %v928_v4, %v917_v6  ;;  %v3285_v2 = vld [vmem:[%s4724_s2 + $0x174] ss:$8 sps:$4 sm:$0xff]   ;;  %v3283_v4 = vld [vmem:[%s4724_s2 + $0x170] ss:$8 sps:$4 sm:$0xff]  }
 0x1a4   :  { %v896_v11 = vadd.f32 %v895_v7, %v894_v1  ;;  %v921_v12 = vrot.slane %v920_v8, 4  ;;  %v3280_v1 = vld [vmem:[%s4724_s2 + $0x160] ss:$8 sps:$4 sm:$0xff]   ;;  %v3291_v7 = vld [vmem:[%s4724_s2 + $0x194] ss:$8 sps:$4 sm:$0xff]  }
 0x1a5   :  { %v905_v14 = vadd.f32 %v904_v9, %v903_v5  ;;  %v930_v15 = vrot.slane %v929_v10, 4  ;;  %v3288_v5 = vld [vmem:[%s4724_s2 + $0x184] ss:$8 sps:$4 sm:$0xff]   ;;  %v3286_v6 = vld [vmem:[%s4724_s2 + $0x180] ss:$8 sps:$4 sm:$0xff]  }
 0x1a6   :  { %v897_v16 = vrot.slane %v896_v11, 2  ;;  %v922_v17 = vadd.f32 %v921_v12, %v920_v8  ;;  %v3289_v8 = vld [vmem:[%s4724_s2 + $0x190] ss:$8 sps:$4 sm:$0xff]   ;;  %v3294_v9 = vld [vmem:[%s4724_s2 + $0x1a4] ss:$8 sps:$4 sm:$0xff]  }
 0x1a7   :  { %v906_v18 = vrot.slane %v905_v14, 2  ;;  %v931_v19 = vadd.f32 %v930_v15, %v929_v10  ;;  %v3292_v10 = vld [vmem:[%s4724_s2 + $0x1a0] ss:$8 sps:$4 sm:$0xff]   ;;  %v3295_v12 = vld [vmem:[%s4724_s2 + $0x1b0] ss:$8 sps:$4 sm:$0xff]  }
 0x1a8   :  { %v898_v20 = vadd.f32 %v897_v16, %v896_v11  ;;  %v923_v21 = vrot.slane %v922_v17, 2  ;;  %v3297_v11 = vld [vmem:[%s4724_s2 + $0x1b4] ss:$8 sps:$4 sm:$0xff]   ;;  %v3298_v15 = vld [vmem:[%s4724_s2 + $0x1c0] ss:$8 sps:$4 sm:$0xff]  }
 0x1a9   :  { %v907_v22 = vadd.f32 %v906_v18, %v905_v14  ;;  %v932_v23 = vrot.slane %v931_v19, 2  ;;  %v3300_v14 = vld [vmem:[%s4724_s2 + $0x1c4] ss:$8 sps:$4 sm:$0xff]   ;;  %v3303_v16 = vld [vmem:[%s4724_s2 + $0x1d4] ss:$8 sps:$4 sm:$0xff]  }
 0x1aa   :  { %v899_v24 = vrot.slane %v898_v20, 1  ;;  %v924_v25 = vadd.f32 %v923_v21, %v922_v17  ;;  %v3301_v17 = vld [vmem:[%s4724_s2 + $0x1d0] ss:$8 sps:$4 sm:$0xff]   ;;  %v3306_v18 = vld [vmem:[%s4724_s2 + $0x1e4] ss:$8 sps:$4 sm:$0xff]  }
 0x1ab   :  { %v908_v26 = vrot.slane %v907_v22, 1  ;;  %v933_v27 = vadd.f32 %v932_v23, %v931_v19  ;;  %v3304_v19 = vld [vmem:[%s4724_s2 + $0x1e0] ss:$8 sps:$4 sm:$0xff]   ;;  %v3307_v21 = vld [vmem:[%s4724_s2 + $0x1f0] ss:$8 sps:$4 sm:$0xff]  }
 0x1ac   :  { %v925_v28 = vrot.slane %v924_v25, 1  ;;  %v900_v30 = vadd.f32 %v899_v24, %v898_v20  ;;  %v3309_v20 = vld [vmem:[%s4724_s2 + $0x1f4] ss:$8 sps:$4 sm:$0xff]  }
 0x1ad   :  { %v934_v29 = vrot.slane %v933_v27, 1  ;;  %v909_v32 = vadd.f32 %v908_v26, %v907_v22  ;;  %v3312_v22 = vld [vmem:[%s4724_s2 + $0x4] ss:$8 sps:$4 sm:$0xff]  }
 0x1ae   :  { %v926_v31 = vadd.f32 %v925_v28, %v924_v25 }
 0x1af   :  { %v935_v33 = vadd.f32 %v934_v29, %v933_v27 }
 0x1b0   :  { %v937_v35 = vsel %vm936_vm2, %v900_v30, %v926_v31 }
 0x1b1   :  { %v938_v36 = vsel %vm936_vm2, %v909_v32, %v935_v33  ;;  %v3415_v33 = vmov 1966171168  }
 0x1b2   :  { %1035 = vmatprep.mubr.f32.mxu1 %v938_v36  ;;  %v1141_v36 = vlaneseq }
 0x1b3   :  { %1036 = vmatmul.mubr.f32.vlgmr.msra.gmra.mrb[0].mxu1 %v937_v35  ;;  %v1139_v35 = vunpack.c.l.s4 %v3415_v33 }
 0x1b4   :  { %3047 = vmatpush1.bf16.msra.mxu1 %v3046_v38  ;;  %1113 = vmatprep.mubr.f32.mxu1 %v3414_v40  ;;  %v1142_v39 = vshrl.u32 %v1141_v36, 7 }
 0x1b5   :  { %1626 = vmatprep.subr.bf16.mxu1 %v3264_v49  ;;  %v1140_v37 = vunpack.c.0.s8 %v1139_v35 }
 0x286   :  { %v2974_v42 = vpop.f32.mrb[0].mxu1 }
 0x287   :  { %v2975_v43 = vpop.f32.mrb[1].mxu1 }
 0x288   :  { %v2976_v44 = vadd.f32 %v2975_v43, %v2974_v42  ;;  %v4142_v42 = vsub.s32 %v1140_v37, %v1142_v39  ;;  %v1314_v37 = vld [vmem:[#allocation2] sm:$0xff] }
 0x28a   :  { %2758 = vmatmul.mubr.msk.f32.vlgmr.msra.gmra.mrb[2].mxu1 %vm1045_vm6, %v2976_v44 }
 0x28b   :  { %1627 = vmatpush1.bf16.msra.mxu1 %v3262_v50 }
 0x28c   :  { %1628 = vmatprep.subr.bf16.mxu1 %v3267_v51  ;;  %v1134_v51 = vld [vmem:[%s4725_s3] sm:$0x3] }
 0x28f   :  { %1629 = vmatpush1.bf16.msra.mxu1 %v3265_v53 }
 0x290   :  { %1630 = vmatprep.subr.bf16.mxu1 %v3270_v54  ;;  %v4149_v54 = vsub.s32 0, %v1142_v39 }
 0x293   :  { %1631 = vmatpush1.bf16.msra.mxu1 %v3268_v55  ;;  %v4151_v55 = vsub.s32 1, %v1142_v39 }
 0x294   :  { %1632 = vmatprep.subr.bf16.mxu1 %v3273_v57 }
 0x297   :  { %1633 = vmatpush1.bf16.msra.mxu1 %v3271_v56 }
 0x298   :  { %1634 = vmatprep.subr.bf16.mxu1 %v3276_v59 }
 0x29b   :  { %1635 = vmatpush1.bf16.msra.mxu1 %v3274_v60 }
 0x29c   :  { %1636 = vmatprep.subr.bf16.mxu1 %v3279_v62 }
 0x29f   :  { %1637 = vmatpush1.bf16.msra.mxu1 %v3277_v13 }
 0x2a0   :  { %1638 = vmatprep.subr.bf16.mxu1 %v3282_v0 }
 0x2a3   :  { %1639 = vmatpush1.bf16.msra.mxu1 %v3280_v1 }
 0x2a4   :  { %1640 = vmatprep.subr.bf16.mxu1 %v3285_v2 }
 0x2a7   :  { %1641 = vmatpush1.bf16.msra.mxu1 %v3283_v4 }
 0x2a8   :  { %1642 = vmatprep.subr.bf16.mxu1 %v3288_v5 }
 0x2ab   :  { %1643 = vmatpush1.bf16.msra.mxu1 %v3286_v6 }
 0x2ac   :  { %1644 = vmatprep.subr.bf16.mxu1 %v3291_v7 }
 0x2af   :  { %1645 = vmatpush1.bf16.msra.mxu1 %v3289_v8 }
 0x2b0   :  { %1646 = vmatprep.subr.bf16.mxu1 %v3294_v9 }
 0x2b3   :  { %1647 = vmatpush1.bf16.msra.mxu1 %v3292_v10 }
 0x2b4   :  { %1648 = vmatprep.subr.bf16.mxu1 %v3297_v11 }
 0x2b7   :  { %1649 = vmatpush1.bf16.msra.mxu1 %v3295_v12 }
 0x2b8   :  { %1650 = vmatprep.subr.bf16.mxu1 %v3300_v14 }
 0x2bb   :  { %1651 = vmatpush1.bf16.msra.mxu1 %v3298_v15 }
 0x2bc   :  { %1652 = vmatprep.subr.bf16.mxu1 %v3303_v16 }
 0x2bf   :  { %1653 = vmatpush1.bf16.msra.mxu1 %v3301_v17 }
 0x2c0   :  { %1654 = vmatprep.subr.bf16.mxu1 %v3306_v18 }
 0x2c3   :  { %1655 = vmatpush1.bf16.msra.mxu1 %v3304_v19 }
 0x2c4   :  { %1656 = vmatprep.subr.bf16.mxu1 %v3309_v20 }
 0x2c7   :  { %1657 = vmatpush1.bf16.msra.mxu1 %v3307_v21 }
 0x2c8   :  { %1859 = vmatprep.subr.bf16.mxu1 %v3312_v22 }
 0x35d   :  { %v1115_v23 = vpop.f32.mrb[2].mxu1 }
 0x35e   :  { %v1120_v24 = vmul.f32 %v1115_v23, %v1115_v23  ;;  %v1117_v25 = vpop.f32.mrb[3].mxu1 }
 0x35f   :  { %v1121_v26 = vmul.f32 %v1117_v25, %v1117_v25 }
 0x360   :  { %v1124_v27 = vrot.slane %v1120_v24, 7 }
 0x361   :  { %v1125_v28 = vrot.slane %v1121_v26, 7 }
 0x362   :  { %v1128_v29 = vsub.f32 %v1115_v23, %v1124_v27 }
 0x363   :  { %v1129_v30 = vsub.f32 %v1117_v25, %v1125_v28 }
 0x364   :  { %v1130_v31 = vadd.f32 1e-05, %v1128_v29 }
 0x365   :  { %v1131_v32 = vadd.f32 1e-05, %v1129_v30 }
 0x366   :  { %3406 = vrsqrt.f32 %v1130_v31 }
 0x367   :  { %3408 = vrsqrt.f32 %v1131_v32 }
 0x370   :  { %v3407_v38 = vpop.eup %3406 }
 0x371   :  { %v3409_v43 = vpop.eup %3408 }
 0x372   :  { %v1137_v44 = vcombine.low %v3407_v38, %v3409_v43 }
 0x374   :  { %v1144_v49 = vrot.slane %v1137_v44, %v4142_v42 }
 0x376   :  { %v1145_v50 = vcombine.high %v1144_v49, %v1144_v49 }
 0x378   :  { %v1152_v53 = vrot.slane %v1145_v50, %v4142_v42  ;;  %v1318_v50 = vld [vmem:[#allocation2 + $0x10] sm:$0x11] }
 0x37a   :  { %v1154_v57 = vmul.f32 %v1152_v53, %v1134_v51 }
 0x37c   :  { %v1160_v56 = vrot.slane %v1154_v57, %v4149_v54  ;;  %v1164_v59 = vrot.slane %v1154_v57, %v4151_v55 }
 0x37e   :  { %v1167_v60 = vmul.f32 %v1160_v56, %v1115_v23  ;;  %v1168_v62 = vmul.f32 %v1164_v59, %v1117_v25  ;;  %v1188_v13 = vmul.f32 %v1160_v56, %v3993_v46  ;;  %v1189_v0 = vmul.f32 %v1164_v59, %v3995_v47  ;;  %v1155_v46 = vld [vmem:[%s4726_s4] sm:$0x3] }
 0x37f   :  { %v1190_v1 = vmul.f32 %v1160_v56, %v3997_v48  ;;  %v1191_v2 = vmul.f32 %v1164_v59, %v4005_v52  ;;  %v1192_v4 = vmul.f32 %v1160_v56, %v4013_v58  ;;  %v1193_v5 = vmul.f32 %v1164_v59, %v4018_v61 }
 0x380   :  { %v1171_v6 = vcombine.low %v1167_v60, %v1168_v62  ;;  %v1194_v7 = vmul.f32 %v1160_v56, %v4023_v63  ;;  %v1195_v8 = vmul.f32 %v1164_v59, %v4028_v3  ;;  %v1321_v59 = vld [vmem:[#allocation2 + $0x18] sm:$0xff]  ;;  %v1325_v60 = vld [vmem:[#allocation2 + $0x28] sm:$0x11] }
 0x382   :  { %v1178_v9 = vrot.slane %v1171_v6, %v4142_v42 }
 0x384   :  { %v1185_v47 = vrot.slane %v1178_v9, %v4142_v42 }
 0x386   :  { %v1187_v48 = vsub.f32 %v1155_v46, %v1185_v47 }
 0x388   :  { %v1200_v52 = vrot.slane %v1187_v48, %v4149_v54  ;;  %v1204_v58 = vrot.slane %v1187_v48, %v4151_v55 }
 0x38a   :  { %v1207_v10 = vadd.f32 %v1200_v52, %v1188_v13  ;;  %v1208_v61 = vadd.f32 %v1204_v58, %v1189_v0  ;;  %v1209_v11 = vadd.f32 %v1200_v52, %v1190_v1  ;;  %v1210_v12 = vadd.f32 %v1204_v58, %v1191_v2 }
 0x38b   :  { %v1211_v63 = vadd.f32 %v1200_v52, %v1192_v4  ;;  %v1212_v14 = vadd.f32 %v1204_v58, %v1193_v5  ;;  %v1213_v3 = vadd.f32 %v1200_v52, %v1194_v7  ;;  %v1214_v15 = vadd.f32 %v1204_v58, %v1195_v8 }
 0x38c   :  { %v1215_v16 = vmax.f32 %v1207_v10, 0.0  ;;  %v1216_v17 = vmax.f32 %v1208_v61, 0.0  ;;  %v1217_v18 = vmax.f32 %v1209_v11, 0.0  ;;  %v1218_v19 = vmax.f32 %v1210_v12, 0.0 }
 0x38d   :  { %v1219_v20 = vmax.f32 %v1211_v63, 0.0  ;;  %v1220_v21 = vmax.f32 %v1212_v14, 0.0  ;;  %v1221_v22 = vmax.f32 %v1213_v3, 0.0  ;;  %v1222_v23 = vmax.f32 %v1214_v15, 0.0 }
 0x38e   :  { %v2938_v24 = vpack.c.bf16 %v1216_v17, %v1215_v16  ;;  %v2939_v25 = vpack.c.bf16 %v1218_v19, %v1217_v18 }
 0x38f   :  { %v2940_v26 = vpack.c.bf16 %v1220_v21, %v1219_v20  ;;  %v2941_v27 = vpack.c.bf16 %v1222_v23, %v1221_v22  ;;  %v3324_v20 = vld [vmem:[%s4724_s2 + $0x44] ss:$8 sps:$4 sm:$0xff]  }
 0x390   :  { %v1270_v28 = vshrl.u32 %v2938_v24, 16  ;;  %v1278_v29 = vshrl.u32 %v2939_v25, 16  ;;  %v1273_v33 = vshll.u32 %v2938_v24, 16  ;;  %v1281_v36 = vshll.u32 %v2939_v25, 16 }
 0x391   :  { %v1287_v30 = vshrl.u32 %v2940_v26, 16  ;;  %v1295_v31 = vshrl.u32 %v2941_v27, 16  ;;  %v1290_v43 = vshll.u32 %v2940_v26, 16  ;;  %v1298_v49 = vshll.u32 %v2941_v27, 16 }
 0x392   :  { %v1272_v32 = vrot.slane %v1270_v28, 7  ;;  %v1280_v35 = vrot.slane %v1278_v29, 7  ;;  %v3336_v29 = vld [vmem:[%s4724_s2 + $0x84] ss:$8 sps:$4 sm:$0xff]  }
 0x393   :  { %v1289_v38 = vrot.slane %v1287_v30, 7  ;;  %v1297_v44 = vrot.slane %v1295_v31, 7 }
 0x394   :  { %v1275_v51 = vor.u32 %v1273_v33, %v1272_v32  ;;  %v1276_v53 = vrot.slane %v1272_v32, 4  ;;  %v1283_v57 = vor.u32 %v1281_v36, %v1280_v35  ;;  %v1285_v56 = vrot.slane %v1280_v35, 4 }
 0x395   :  { %v1292_v62 = vor.u32 %v1290_v43, %v1289_v38  ;;  %v1293_v13 = vrot.slane %v1289_v38, 4  ;;  %v1300_v0 = vor.u32 %v1298_v49, %v1297_v44  ;;  %v1302_v1 = vrot.slane %v1297_v44, 4 }
 0x396   :  { %v4177_v2 = vsel %vm4171_vm11, %v1276_v53, %v1283_v57  ;;  %v4184_v4 = vsel %vm1313_vm4, %v1275_v51, %v1314_v37  ;;  %v1319_v5 = vsel %vm3961_vm10, %v1285_v56, %v1318_v50 }
 0x397   :  { %v4190_v6 = vsel %vm4171_vm11, %v1293_v13, %v1300_v0  ;;  %1316 = vst [vmem:[#allocation2] sm:$0xff] %v4184_v4  ;;  %1320 = vst [vmem:[#allocation2 + $0x10] sm:$0x11] %v1319_v5  ;;  %v4198_v7 = vsel %vm1313_vm4, %v1292_v62, %v1321_v59  ;;  %v1326_v8 = vsel %vm3961_vm10, %v1302_v1, %v1325_v60  ;;  %v1370_v9 = vshrl.u32 %v4184_v4, 16 }
 0x398   :  { %1323 = vst [vmem:[#allocation2 + $0x18] sm:$0xff] %v4198_v7  ;;  %1327 = vst [vmem:[#allocation2 + $0x28] sm:$0x11] %v1326_v8  ;;  %v1373_v46 = vshll.u32 %v4184_v4, 16  ;;  %v1379_v47 = vshll.u32 %v4177_v2, 16  ;;  %v1383_v48 = vshrl.u32 %v4177_v2, 16  ;;  %v2832_v15 = vcombine.high %v4184_v4, %v4177_v2 }
 0x399   :  { %v1394_v41 = vshrl.u32 %v4198_v7, 16  ;;  %v1372_v45 = vrot.slane %v1370_v9, 4  ;;  %v1397_v52 = vshll.u32 %v4198_v7, 16  ;;  %v1403_v58 = vshll.u32 %v4190_v6, 16  ;;  %vm4219_vm10 = vmor %vm1366_vm8, %vm1367_vm9  ;;  %v3310_v8 = vld [vmem:[%s4724_s2] ss:$8 sps:$4 sm:$0xff]  }
 0x39a   :  { %v1407_v34 = vshrl.u32 %v4190_v6, 16  ;;  %v1375_v10 = vrot.slane %v1373_v46, 5  ;;  %v1381_v61 = vrot.slane %v1379_v47, 5  ;;  %v1385_v11 = vrot.slane %v1383_v48, 4  ;;  %v3315_v48 = vld [vmem:[%s4724_s2 + $0x14] ss:$8 sps:$4 sm:$0xff]  }
 0x39b   :  { %v1396_v12 = vrot.slane %v1394_v41, 4  ;;  %v1399_v63 = vrot.slane %v1397_v52, 5  ;;  %v1405_v14 = vrot.slane %v1403_v58, 5  ;;  %v2831_v18 = vcombine.low %v4184_v4, %v4177_v2  ;;  %v3369_v4 = vld [vmem:[%s4724_s2 + $0x234] ss:$8 sps:$4 sm:$0xff]  }
 0x39c   :  { %v1409_v3 = vrot.slane %v1407_v34, 4  ;;  %v1376_v16 = vor.u32 %v1375_v10, %v1372_v45  ;;  %v1386_v17 = vor.u32 %v1385_v11, %v1381_v61  ;;  %v2834_v19 = vcombine.high %v4198_v7, %v4190_v6  ;;  %v3313_v34 = vld [vmem:[%s4724_s2 + $0x10] ss:$8 sps:$4 sm:$0xff]   ;;  %v3318_v10 = vld [vmem:[%s4724_s2 + $0x24] ss:$8 sps:$4 sm:$0xff]  }
 0x39d   :  { %v1400_v21 = vor.u32 %v1399_v63, %v1396_v12  ;;  %v2833_v23 = vcombine.low %v4198_v7, %v4190_v6  ;;  %v1923_v24 = vrot.slane %v4177_v2, 5  ;;  %v1930_v51 = vrot.slane %v4190_v6, 5  ;;  %v3321_v11 = vld [vmem:[%s4724_s2 + $0x34] ss:$8 sps:$4 sm:$0xff]   ;;  %v2267_v12 = vld [vmem:[%s4722_s7 + $0x80] sm:$0xff]  ;;  %v2268_v63 = vld [vmem:[%s4722_s7 + $0x88] sm:$0xff] }
 0x39e   :  { %v1410_v22 = vor.u32 %v1409_v3, %v1405_v14  ;;  %v1364_v25 = vld [vmem:[#allocation2 + $0x10] sm:$0x11]  ;;  %v1377_v26 = vrot.slane %v1376_v16, 4  ;;  %v1387_v27 = vrot.slane %v1386_v17, 4  ;;  %v1912_v28 = vld [vmem:[#allocation2] sm:$0xee]  ;;  %v3048_v16 = vpack.c.bf16 %v2268_v63, %v2267_v12 }
 0x39f   :  { %v1389_v30 = vshll.u32 %v1364_v25, 16  ;;  %v1365_v31 = vld [vmem:[#allocation2 + $0x28] sm:$0x11]  ;;  %v1401_v32 = vrot.slane %v1400_v21, 4  ;;  %v2867_v35 = vrot.slane %v1912_v28, 9  ;;  %v1925_v39 = vrot.slane %v1923_v24, 4 }
 0x3a0   :  { %v1411_v33 = vrot.slane %v1410_v22, 4  ;;  %v1382_v36 = vsel %vm4219_vm10, %v1377_v26, %v1381_v61  ;;  %v1413_v37 = vshll.u32 %v1365_v31, 16  ;;  %v1926_v38 = vrot.slane %v1364_v25, 5  ;;  %v1913_v50 = vld [vmem:[#allocation2 + $0x18] sm:$0xee]  ;;  %v2252_v17 = vld [vmem:[%s4722_s7 + $0x8] sm:$0xff]  ;;  %3049 = vmatprep.subr.bf16.mxu0 %v3048_v16 }
 0x3a1   :  { %v1391_v43 = vrot.slane %v1389_v30, 5  ;;  %v1406_v44 = vsel %vm4219_vm10, %v1401_v32, %v1405_v14  ;;  %v4238_v49 = vsel %vm4228_vm13, %v2867_v35, %v1923_v24  ;;  %v2868_v56 = vrot.slane %v1913_v50, 9  ;;  %v3316_v61 = vld [vmem:[%s4724_s2 + $0x20] ss:$8 sps:$4 sm:$0xff]   ;;  %v3319_v3 = vld [vmem:[%s4724_s2 + $0x30] ss:$8 sps:$4 sm:$0xff]  }
 0x3a2   :  { %v1415_v53 = vrot.slane %v1413_v37, 5  ;;  %v4243_v57 = vsel %vm4228_vm13, %v1925_v39, %v1926_v38  ;;  %v1933_v59 = vrot.slane %v1365_v31, 5  ;;  %v1932_v0 = vrot.slane %v1930_v51, 4  ;;  %v2251_v14 = vld [vmem:[%s4722_s7] sm:$0xff]  ;;  %v3327_v22 = vld [vmem:[%s4724_s2 + $0x54] ss:$8 sps:$4 sm:$0xff]  }
 0x3a3   :  { %v1392_v60 = vsel %vm4219_vm10, %v1387_v27, %v1391_v43  ;;  %v2901_v62 = vcombine.low %v4238_v49, %v4243_v57  ;;  %v2902_v13 = vcombine.high %v4238_v49, %v4243_v57  ;;  %v4258_v46 = vsel %vm4228_vm13, %v2868_v56, %v1930_v51  ;;  %v3325_v24 = vld [vmem:[%s4724_s2 + $0x50] ss:$8 sps:$4 sm:$0xff]   ;;  %v3330_v25 = vld [vmem:[%s4724_s2 + $0x64] ss:$8 sps:$4 sm:$0xff]   ;;  %v3328_v26 = vld [vmem:[%s4724_s2 + $0x60] ss:$8 sps:$4 sm:$0xff]  }
 0x3a4   :  { %v2795_v1 = vcombine.low %v1382_v36, %v1392_v60  ;;  %v2796_v5 = vcombine.high %v1382_v36, %v1392_v60  ;;  %v1416_v9 = vsel %vm4219_vm10, %v1411_v33, %v1415_v53  ;;  %v4265_v45 = vsel %vm4228_vm13, %v1932_v0, %v1933_v59  ;;  %v3333_v27 = vld [vmem:[%s4724_s2 + $0x74] ss:$8 sps:$4 sm:$0xff]   ;;  %v3331_v28 = vld [vmem:[%s4724_s2 + $0x70] ss:$8 sps:$4 sm:$0xff]   ;;  %v3334_v30 = vld [vmem:[%s4724_s2 + $0x80] ss:$8 sps:$4 sm:$0xff]  }
 0x3a5   :  { %v2798_v47 = vcombine.high %v1406_v44, %v1416_v9  ;;  %v2797_v41 = vcombine.low %v1406_v44, %v1416_v9  ;;  %v2904_v52 = vcombine.high %v4258_v46, %v4265_v45  ;;  %v2903_v58 = vcombine.low %v4258_v46, %v4265_v45  ;;  %v3339_v31 = vld [vmem:[%s4724_s2 + $0x94] ss:$8 sps:$4 sm:$0xff]   ;;  %v3337_v32 = vld [vmem:[%s4724_s2 + $0x90] ss:$8 sps:$4 sm:$0xff]   ;;  %v3342_v33 = vld [vmem:[%s4724_s2 + $0xa4] ss:$8 sps:$4 sm:$0xff]  }
 0x3a6   :  { %1658 = vmatprep.mubr.bf16.mxu1 %v2796_v5  ;;  %v3050_v21 = vpack.c.bf16 %v2252_v17, %v2251_v14  ;;  %v3340_v35 = vld [vmem:[%s4724_s2 + $0xa0] ss:$8 sps:$4 sm:$0xff]   ;;  %v3345_v36 = vld [vmem:[%s4724_s2 + $0xb4] ss:$8 sps:$4 sm:$0xff]   ;;  %v3343_v37 = vld [vmem:[%s4724_s2 + $0xb0] ss:$8 sps:$4 sm:$0xff]  }
 0x3a7   :  { %1659 = vmatmul.mubr.bf16.vlgmr.msra.gmra.mrb[4].mxu1 %v2795_v1  ;;  %v3348_v39 = vld [vmem:[%s4724_s2 + $0xc4] ss:$8 sps:$4 sm:$0xff]   ;;  %v3346_v38 = vld [vmem:[%s4724_s2 + $0xc0] ss:$8 sps:$4 sm:$0xff]   ;;  %v3351_v43 = vld [vmem:[%s4724_s2 + $0xd4] ss:$8 sps:$4 sm:$0xff]  }
 0x3a8   :  { %1860 = vmatpush1.bf16.msra.mxu1 %v3310_v8  ;;  %1668 = vmatprep.mubr.bf16.mxu1 %v2798_v47  ;;  %v3349_v44 = vld [vmem:[%s4724_s2 + $0xd0] ss:$8 sps:$4 sm:$0xff]   ;;  %v3354_v50 = vld [vmem:[%s4724_s2 + $0xe4] ss:$8 sps:$4 sm:$0xff]   ;;  %v3352_v51 = vld [vmem:[%s4724_s2 + $0xe0] ss:$8 sps:$4 sm:$0xff]  }
 0x3a9   :  { %1861 = vmatprep.subr.bf16.mxu1 %v3315_v48  ;;  %3051 = vmatpush3.bf16.msra.mxu0 %v3050_v21  ;;  %v3357_v53 = vld [vmem:[%s4724_s2 + $0xf4] ss:$8 sps:$4 sm:$0xff]   ;;  %v3355_v56 = vld [vmem:[%s4724_s2 + $0xf0] ss:$8 sps:$4 sm:$0xff]   ;;  %v3360_v59 = vld [vmem:[%s4724_s2 + $0x204] ss:$8 sps:$4 sm:$0xff]  }
 0x3aa   :  { %v3358_v60 = vld [vmem:[%s4724_s2 + $0x200] ss:$8 sps:$4 sm:$0xff]   ;;  %v3363_v0 = vld [vmem:[%s4724_s2 + $0x214] ss:$8 sps:$4 sm:$0xff]   ;;  %v3361_v1 = vld [vmem:[%s4724_s2 + $0x210] ss:$8 sps:$4 sm:$0xff]  }
 0x3ab   :  { %v3366_v5 = vld [vmem:[%s4724_s2 + $0x224] ss:$8 sps:$4 sm:$0xff]   ;;  %v3364_v2 = vld [vmem:[%s4724_s2 + $0x220] ss:$8 sps:$4 sm:$0xff]   ;;  %v3375_v7 = vld [vmem:[%s4724_s2 + $0x254] ss:$8 sps:$4 sm:$0xff]  }
 0x3ac   :  { %1862 = vmatpush1.bf16.msra.mxu1 %v3313_v34  ;;  %v3370_v6 = vld [vmem:[%s4724_s2 + $0x240] ss:$8 sps:$4 sm:$0xff]   ;;  %v3381_v9 = vld [vmem:[%s4724_s2 + $0x274] ss:$8 sps:$4 sm:$0xff]   ;;  %v3379_v47 = vld [vmem:[%s4724_s2 + $0x270] ss:$8 sps:$4 sm:$0xff]  }
 0x3ad   :  { %1863 = vmatprep.subr.bf16.mxu1 %v3318_v10  ;;  %v3376_v8 = vld [vmem:[%s4724_s2 + $0x260] ss:$8 sps:$4 sm:$0xff]   ;;  %v3384_v48 = vld [vmem:[%s4724_s2 + $0x284] ss:$8 sps:$4 sm:$0xff]   ;;  %v3387_v34 = vld [vmem:[%s4724_s2 + $0x294] ss:$8 sps:$4 sm:$0xff]  }
 0x3ae   :  { %v3385_v10 = vld [vmem:[%s4724_s2 + $0x290] ss:$8 sps:$4 sm:$0xff]   ;;  %v3393_v12 = vld [vmem:[%s4724_s2 + $0x2b4] ss:$8 sps:$4 sm:$0xff]   ;;  %v3396_v14 = vld [vmem:[%s4724_s2 + $0x2c4] ss:$8 sps:$4 sm:$0xff]  }
 0x3af   :  { %1669 = vmatmul.mubr.bf16.gmra.mrb[8].mxu1 %v2797_v41  ;;  %v3382_v41 = vld [vmem:[%s4724_s2 + $0x280] ss:$8 sps:$4 sm:$0xff]   ;;  %v3391_v63 = vld [vmem:[%s4724_s2 + $0x2b0] ss:$8 sps:$4 sm:$0xff]   ;;  %v3399_v16 = vld [vmem:[%s4724_s2 + $0x2d4] ss:$8 sps:$4 sm:$0xff]  }
 0x3b0   :  { %1864 = vmatpush1.bf16.msra.mxu1 %v3316_v61  ;;  %1891 = vmatprep.mubr.bf16.mxu1 %v2832_v15  ;;  %v3322_v15 = vld [vmem:[%s4724_s2 + $0x40] ss:$8 sps:$4 sm:$0xff]   ;;  %v3390_v61 = vld [vmem:[%s4724_s2 + $0x2a4] ss:$8 sps:$4 sm:$0xff]   ;;  %v3397_v17 = vld [vmem:[%s4724_s2 + $0x2d0] ss:$8 sps:$4 sm:$0xff]  }
 0x3b1   :  { %1865 = vmatprep.subr.bf16.mxu1 %v3321_v11  ;;  %v3388_v11 = vld [vmem:[%s4724_s2 + $0x2a0] ss:$8 sps:$4 sm:$0xff]   ;;  %v2253_v49 = vld [vmem:[%s4722_s7 + $0x10] sm:$0xff]  ;;  %v2254_v57 = vld [vmem:[%s4722_s7 + $0x18] sm:$0xff] }
 0x3b2   :  { %v3400_v21 = vld [vmem:[%s4724_s2 + $0x2e0] ss:$8 sps:$4 sm:$0xff]   ;;  %v3054_v46 = vpack.c.bf16 %v2254_v57, %v2253_v49 }
 0x3b3   :  { %v2272_v45 = vld [vmem:[%s4722_s7 + $0xa8] sm:$0xff] }
 0x3b4   :  { %1866 = vmatpush1.bf16.msra.mxu1 %v3319_v3  ;;  %v3394_v3 = vld [vmem:[%s4724_s2 + $0x2c0] ss:$8 sps:$4 sm:$0xff]  }
 0x3b5   :  { %1867 = vmatprep.subr.bf16.mxu1 %v3324_v20  ;;  %v3402_v20 = vld [vmem:[%s4724_s2 + $0x2e4] ss:$8 sps:$4 sm:$0xff]  }
 0x3b8   :  { %1868 = vmatpush1.bf16.msra.mxu1 %v3322_v15  ;;  %v3405_v15 = vld [vmem:[%s4724_s2 + $0x2f4] ss:$8 sps:$4 sm:$0xff]  }
 0x3b9   :  { %1869 = vmatprep.subr.bf16.mxu1 %v3327_v22  ;;  %v3403_v22 = vld [vmem:[%s4724_s2 + $0x2f0] ss:$8 sps:$4 sm:$0xff]  }
 0x3bc   :  { %1870 = vmatpush1.bf16.msra.mxu1 %v3325_v24  ;;  %v2269_v24 = vld [vmem:[%s4722_s7 + $0x90] sm:$0xff] }
 0x3bd   :  { %1871 = vmatprep.subr.bf16.mxu1 %v3330_v25  ;;  %v2270_v25 = vld [vmem:[%s4722_s7 + $0x98] sm:$0xff] }
 0x3c0   :  { %1872 = vmatpush1.bf16.msra.mxu1 %v3328_v26  ;;  %v3052_v26 = vpack.c.bf16 %v2270_v25, %v2269_v24 }
 0x3c1   :  { %1873 = vmatprep.subr.bf16.mxu1 %v3333_v27 }
 0x3c2   :  { %3053 = vmatprep.subr.bf16.mxu0 %v3052_v26 }
 0x3c3   :  { %3055 = vmatpush3.bf16.msra.mxu0 %v3054_v46 }
 0x3c4   :  { %1874 = vmatpush1.bf16.msra.mxu1 %v3331_v28 }
 0x3c5   :  { %1875 = vmatprep.subr.bf16.mxu1 %v3336_v29  ;;  %v2273_v29 = vld [vmem:[%s4722_s7 + $0xb0] sm:$0xff] }
 0x3c8   :  { %1876 = vmatpush1.bf16.msra.mxu1 %v3334_v30  ;;  %v2274_v30 = vld [vmem:[%s4722_s7 + $0xb8] sm:$0xff] }
 0x3c9   :  { %1877 = vmatprep.subr.bf16.mxu1 %v3339_v31  ;;  %v3060_v31 = vpack.c.bf16 %v2274_v30, %v2273_v29 }
 0x3cc   :  { %1878 = vmatpush1.bf16.msra.mxu1 %v3337_v32  ;;  %v2257_v32 = vld [vmem:[%s4722_s7 + $0x30] sm:$0xff] }
 0x3cd   :  { %1879 = vmatprep.subr.bf16.mxu1 %v3342_v33  ;;  %v2258_v33 = vld [vmem:[%s4722_s7 + $0x38] sm:$0xff] }
 0x3d0   :  { %1880 = vmatpush1.bf16.msra.mxu1 %v3340_v35  ;;  %v3062_v35 = vpack.c.bf16 %v2258_v33, %v2257_v32 }
 0x3d1   :  { %1881 = vmatprep.subr.bf16.mxu1 %v3345_v36  ;;  %v2275_v36 = vld [vmem:[%s4722_s7 + $0xc0] sm:$0xff] }
 0x3d4   :  { %1882 = vmatpush1.bf16.msra.mxu1 %v3343_v37  ;;  %v2276_v37 = vld [vmem:[%s4722_s7 + $0xc8] sm:$0xff] }
 0x3d5   :  { %1883 = vmatprep.subr.bf16.mxu1 %v3348_v39  ;;  %v3064_v39 = vpack.c.bf16 %v2276_v37, %v2275_v36 }
 0x3d8   :  { %1884 = vmatpush1.bf16.msra.mxu1 %v3346_v38  ;;  %v2259_v38 = vld [vmem:[%s4722_s7 + $0x40] sm:$0xff] }
 0x3d9   :  { %1885 = vmatprep.subr.bf16.mxu1 %v3351_v43  ;;  %v2260_v43 = vld [vmem:[%s4722_s7 + $0x48] sm:$0xff] }
 0x3dc   :  { %1886 = vmatpush1.bf16.msra.mxu1 %v3349_v44  ;;  %v3066_v44 = vpack.c.bf16 %v2260_v43, %v2259_v38 }
 0x3dd   :  { %1887 = vmatprep.subr.bf16.mxu1 %v3354_v50  ;;  %v2277_v50 = vld [vmem:[%s4722_s7 + $0xd0] sm:$0xff] }
 0x3e0   :  { %1888 = vmatpush1.bf16.msra.mxu1 %v3352_v51  ;;  %v2278_v51 = vld [vmem:[%s4722_s7 + $0xd8] sm:$0xff] }
 0x3e1   :  { %1889 = vmatprep.subr.bf16.mxu1 %v3357_v53  ;;  %v2261_v53 = vld [vmem:[%s4722_s7 + $0x50] sm:$0xff] }
 0x3e4   :  { %1890 = vmatpush1.bf16.msra.mxu1 %v3355_v56  ;;  %v3068_v56 = vpack.c.bf16 %v2278_v51, %v2277_v50 }
 0x3e5   :  { %2144 = vmatprep.subr.bf16.mxu1 %v3360_v59  ;;  %v2262_v59 = vld [vmem:[%s4722_s7 + $0x58] sm:$0xff] }
 0x3e7   :  { %1892 = vmatmul.mubr.bf16.vlgmr.msra.gmra.mrb[4].mxu1 %v2831_v18  ;;  %v3367_v18 = vld [vmem:[%s4724_s2 + $0x230] ss:$8 sps:$4 sm:$0xff]  }
 0x3e8   :  { %1901 = vmatprep.mubr.bf16.mxu1 %v2834_v19  ;;  %2145 = vmatpush1.bf16.msra.mxu1 %v3358_v60  ;;  %v3372_v19 = vld [vmem:[%s4724_s2 + $0x244] ss:$8 sps:$4 sm:$0xff]  }
 0x3e9   :  { %2146 = vmatprep.subr.bf16.mxu1 %v3363_v0  ;;  %v2279_v60 = vld [vmem:[%s4722_s7 + $0xe0] sm:$0xff]  ;;  %v2280_v0 = vld [vmem:[%s4722_s7 + $0xe8] sm:$0xff] }
 0x3ec   :  { %2147 = vmatpush1.bf16.msra.mxu1 %v3361_v1  ;;  %v3070_v1 = vpack.c.bf16 %v2262_v59, %v2261_v53 }
 0x3ed   :  { %2148 = vmatprep.subr.bf16.mxu1 %v3366_v5  ;;  %v3072_v5 = vpack.c.bf16 %v2280_v0, %v2279_v60 }
 0x3ef   :  { %1902 = vmatmul.mubr.bf16.gmra.mrb[8].mxu1 %v2833_v23  ;;  %v3373_v23 = vld [vmem:[%s4724_s2 + $0x250] ss:$8 sps:$4 sm:$0xff]  }
 0x3f0   :  { %2149 = vmatpush1.bf16.msra.mxu1 %v3364_v2  ;;  %2176 = vmatprep.mubr.bf16.mxu1 %v2902_v13  ;;  %v3378_v13 = vld [vmem:[%s4724_s2 + $0x264] ss:$8 sps:$4 sm:$0xff]  }
 0x3f1   :  { %2150 = vmatprep.subr.bf16.mxu1 %v3369_v4  ;;  %v2263_v2 = vld [vmem:[%s4722_s7 + $0x60] sm:$0xff]  ;;  %v2264_v4 = vld [vmem:[%s4722_s7 + $0x68] sm:$0xff] }
 0x3f4   :  { %2151 = vmatpush1.bf16.msra.mxu1 %v3367_v18  ;;  %v2281_v18 = vld [vmem:[%s4722_s7 + $0xf0] sm:$0xff] }
 0x3f5   :  { %2152 = vmatprep.subr.bf16.mxu1 %v3372_v19  ;;  %v2282_v19 = vld [vmem:[%s4722_s7 + $0xf8] sm:$0xff] }
 0x3f8   :  { %2153 = vmatpush1.bf16.msra.mxu1 %v3370_v6  ;;  %v3074_v6 = vpack.c.bf16 %v2264_v4, %v2263_v2 }
 0x3f9   :  { %2154 = vmatprep.subr.bf16.mxu1 %v3375_v7  ;;  %v3076_v7 = vpack.c.bf16 %v2282_v19, %v2281_v18 }
 0x3fc   :  { %2155 = vmatpush1.bf16.msra.mxu1 %v3373_v23  ;;  %v2265_v23 = vld [vmem:[%s4722_s7 + $0x70] sm:$0xff] }
 0x3fd   :  { %2156 = vmatprep.subr.bf16.mxu1 %v3378_v13  ;;  %v2266_v13 = vld [vmem:[%s4722_s7 + $0x78] sm:$0xff] }
 0x400   :  { %2157 = vmatpush1.bf16.msra.mxu1 %v3376_v8  ;;  %v2354_v8 = vld [vmem:[%s4723_s8 + $0x8] sm:$0xff] }
 0x401   :  { %2158 = vmatprep.subr.bf16.mxu1 %v3381_v9  ;;  %v2356_v9 = vld [vmem:[%s4723_s8 + $0x18] sm:$0xff] }
 0x404   :  { %2159 = vmatpush1.bf16.msra.mxu1 %v3379_v47  ;;  %v3078_v47 = vpack.c.bf16 %v2266_v13, %v2265_v23  ;;  %v2353_v23 = vld [vmem:[%s4723_s8] sm:$0xff]  ;;  %v2355_v13 = vld [vmem:[%s4723_s8 + $0x10] sm:$0xff] }
 0x405   :  { %2160 = vmatprep.subr.bf16.mxu1 %v3384_v48  ;;  %v3080_v48 = vpack.c.bf16 %v2356_v9, %v2354_v8  ;;  %v3082_v8 = vpack.c.bf16 %v2355_v13, %v2353_v23 }
 0x408   :  { %2161 = vmatpush1.bf16.msra.mxu1 %v3382_v41 }
 0x409   :  { %2162 = vmatprep.subr.bf16.mxu1 %v3387_v34 }
 0x40c   :  { %2163 = vmatpush1.bf16.msra.mxu1 %v3385_v10 }
 0x40d   :  { %2164 = vmatprep.subr.bf16.mxu1 %v3390_v61 }
 0x410   :  { %2165 = vmatpush1.bf16.msra.mxu1 %v3388_v11 }
 0x411   :  { %2166 = vmatprep.subr.bf16.mxu1 %v3393_v12 }
 0x414   :  { %2167 = vmatpush1.bf16.msra.mxu1 %v3391_v63 }
 0x415   :  { %2168 = vmatprep.subr.bf16.mxu1 %v3396_v14 }
 0x418   :  { %2169 = vmatpush1.bf16.msra.mxu1 %v3394_v3 }
 0x419   :  { %2170 = vmatprep.subr.bf16.mxu1 %v3399_v16 }
 0x41c   :  { %2171 = vmatpush1.bf16.msra.mxu1 %v3397_v17 }
 0x41d   :  { %2172 = vmatprep.subr.bf16.mxu1 %v3402_v20 }
 0x420   :  { %2173 = vmatpush1.bf16.msra.mxu1 %v3400_v21 }
 0x421   :  { %2174 = vmatprep.subr.bf16.mxu1 %v3405_v15 }
 0x424   :  { %2175 = vmatpush1.bf16.msra.mxu1 %v3403_v22 }
 0x427   :  { %2177 = vmatmul.mubr.bf16.vlgmr.msra.gmra.mrb[4].mxu1 %v2901_v62  ;;  %v2271_v62 = vld [vmem:[%s4722_s7 + $0xa0] sm:$0xff] }
 0x428   :  { %2186 = vmatprep.mubr.bf16.mxu1 %v2904_v52  ;;  %v2255_v52 = vld [vmem:[%s4722_s7 + $0x20] sm:$0xff]  ;;  %v3056_v27 = vpack.c.bf16 %v2272_v45, %v2271_v62 }
 0x42a   :  { %3057 = vmatprep.subr.bf16.mxu0 %v3056_v27 }
 0x42f   :  { %2187 = vmatmul.mubr.bf16.gmra.mrb[8].mxu1 %v2903_v58  ;;  %v2256_v58 = vld [vmem:[%s4722_s7 + $0x28] sm:$0xff] }
 0x430   :  { %v3058_v28 = vpack.c.bf16 %v2256_v58, %v2255_v52 }
 0x432   :  { %3059 = vmatpush3.bf16.msra.mxu0 %v3058_v28 }
 0x433   :  { %3061 = vmatprep.subr.bf16.mxu0 %v3060_v31 }
 0x436   :  { %3063 = vmatpush3.bf16.msra.mxu0 %v3062_v35 }
 0x437   :  { %3065 = vmatprep.subr.bf16.mxu0 %v3064_v39 }
 0x43a   :  { %3067 = vmatpush3.bf16.msra.mxu0 %v3066_v44 }
 0x43b   :  { %3069 = vmatprep.subr.bf16.mxu0 %v3068_v56 }
 0x43e   :  { %3071 = vmatpush3.bf16.msra.mxu0 %v3070_v1 }
 0x43f   :  { %3073 = vmatprep.subr.bf16.mxu0 %v3072_v5 }
 0x442   :  { %3075 = vmatpush3.bf16.msra.mxu0 %v3074_v6 }
 0x443   :  { %3077 = vmatprep.subr.bf16.mxu0 %v3076_v7 }
 0x446   :  { %3079 = vmatpush3.bf16.msra.mxu0 %v3078_v47 }
 0x447   :  { %3081 = vmatprep.subr.bf16.mxu0 %v3080_v48 }
 0x4fa   :  { %v4580_v41 = vpop.f32.mrb[4].mxu1 }
 0x4fb   :  { %v4582_v34 = vpop.f32.mrb[5].mxu1  ;;  %v2223_v61 = vmul.f32 %v4580_v41, %v4580_v41 }
 0x4fc   :  { %v4584_v10 = vpop.f32.mrb[6].mxu1  ;;  %v2224_v14 = vmul.f32 %v4582_v34, %v4582_v34 }
 0x4fd   :  { %v2205_v11 = vadd.f32 %v4584_v10, %v4580_v41  ;;  %v2225_v12 = vmul.f32 %v4584_v10, %v4584_v10  ;;  %v4592_v63 = vpop.f32.mrb[7].mxu1 }
 0x4fe   :  { %v2214_v3 = vadd.f32 %v4592_v63, %v4582_v34  ;;  %v2226_v16 = vmul.f32 %v4592_v63, %v4592_v63 }
 0x4ff   :  { %v2231_v17 = vadd.f32 %v2225_v12, %v2223_v61 }
 0x500   :  { %v2240_v20 = vadd.f32 %v2226_v16, %v2224_v14 }
 0x502   :  { %v4600_v21 = vpop.f32.mrb[8].mxu1 }
 0x503   :  { %v2206_v15 = vadd.f32 %v2205_v11, %v4600_v21  ;;  %v2227_v22 = vmul.f32 %v4600_v21, %v4600_v21  ;;  %v4605_v24 = vpop.f32.mrb[9].mxu1 }
 0x504   :  { %v2215_v25 = vadd.f32 %v2214_v3, %v4605_v24  ;;  %v2228_v26 = vmul.f32 %v4605_v24, %v4605_v24  ;;  %v4610_v49 = vpop.f32.mrb[10].mxu1 }
 0x505   :  { %v2232_v57 = vadd.f32 %v2231_v17, %v2227_v22  ;;  %v2207_v62 = vadd.f32 %v2206_v15, %v4610_v49  ;;  %v2229_v46 = vmul.f32 %v4610_v49, %v4610_v49  ;;  %v4615_v45 = vpop.f32.mrb[11].mxu1 }
 0x506   :  { %v2241_v52 = vadd.f32 %v2240_v20, %v2228_v26  ;;  %v2216_v58 = vadd.f32 %v2215_v25, %v4615_v45  ;;  %v2230_v27 = vmul.f32 %v4615_v45, %v4615_v45 }
 0x507   :  { %v2208_v28 = vrot.slane %v2207_v62, 4  ;;  %v2233_v29 = vadd.f32 %v2232_v57, %v2229_v46  ;;  %v2445_v46 = vld [vmem:[%s4727_s5] sm:$0x3] }
 0x508   :  { %v2217_v30 = vrot.slane %v2216_v58, 4  ;;  %v2242_v31 = vadd.f32 %v2241_v52, %v2230_v27 }
 0x509   :  { %v2209_v32 = vadd.f32 %v2208_v28, %v2207_v62  ;;  %v2234_v33 = vrot.slane %v2233_v29, 4  ;;  %v2500_v28 = vld [vmem:[%s4721_s0 + $0x8] sm:$0xfe] }
 0x50a   :  { %v2218_v35 = vadd.f32 %v2217_v30, %v2216_v58  ;;  %v2243_v36 = vrot.slane %v2242_v31, 4  ;;  %v2499_v58 = vld [vmem:[%s4721_s0] sm:$0xfe]  ;;  %v2502_v30 = vld [vmem:[%s4721_s0 + $0x18] sm:$0xff] }
 0x50b   :  { %v2210_v37 = vrot.slane %v2209_v32, 2  ;;  %v2235_v39 = vadd.f32 %v2234_v33, %v2233_v29  ;;  %v2501_v29 = vld [vmem:[%s4721_s0 + $0x10] sm:$0xff]  ;;  %v2503_v33 = vld [vmem:[%s4721_s0 + $0x20] sm:$0x1] }
 0x50c   :  { %v2219_v38 = vrot.slane %v2218_v35, 2  ;;  %v2244_v43 = vadd.f32 %v2243_v36, %v2242_v31  ;;  %v2523_v36 = vrot.slane %v2499_v58, 1 }
 0x50d   :  { %v2211_v44 = vadd.f32 %v2210_v37, %v2209_v32  ;;  %v2236_v50 = vrot.slane %v2235_v39, 2  ;;  %v2524_v37 = vrot.slane %v2501_v29, 1 }
 0x50e   :  { %v2220_v51 = vadd.f32 %v2219_v38, %v2218_v35  ;;  %v2245_v53 = vrot.slane %v2244_v43, 2  ;;  %v2504_v35 = vld [vmem:[%s4721_s0 + $0x28] sm:$0x1]  ;;  %v2527_v38 = vrot.slane %v2502_v30, 1 }
 0x50f   :  { %v2212_v56 = vrot.slane %v2211_v44, 1  ;;  %v2237_v59 = vadd.f32 %v2236_v50, %v2235_v39  ;;  %v2526_v39 = vrot.slane %v2500_v28, 1  ;;  %v2505_v50 = vld [vmem:[%s4721_s0 + $0x30] sm:$0xfe] }
 0x510   :  { %v2221_v60 = vrot.slane %v2220_v51, 1  ;;  %v2246_v0 = vadd.f32 %v2245_v53, %v2244_v43  ;;  %v2507_v53 = vld [vmem:[%s4721_s0 + $0x40] sm:$0xff]  ;;  %v2533_v23 = vrot.slane %v2505_v50, 1 }
 0x511   :  { %v2238_v1 = vrot.slane %v2237_v59, 1  ;;  %v2213_v2 = vadd.f32 %v2212_v56, %v2211_v44  ;;  %v2534_v13 = vrot.slane %v2507_v53, 1 }
 0x512   :  { %v2247_v5 = vrot.slane %v2246_v0, 1  ;;  %v2222_v18 = vadd.f32 %v2221_v60, %v2220_v51  ;;  %v2506_v51 = vld [vmem:[%s4721_s0 + $0x38] sm:$0xfe]  ;;  %v2508_v60 = vld [vmem:[%s4721_s0 + $0x48] sm:$0xff] }
 0x513   :  { %v2239_v4 = vadd.f32 %v2238_v1, %v2237_v59  ;;  %v2510_v1 = vld [vmem:[%s4721_s0 + $0x58] sm:$0x1] }
 0x514   :  { %v2248_v19 = vadd.f32 %v2247_v5, %v2246_v0  ;;  %v2509_v0 = vld [vmem:[%s4721_s0 + $0x50] sm:$0x1] }
 0x515   :  { %v2249_v6 = vsel %vm936_vm2, %v2213_v2, %v2239_v4 }
 0x516   :  { %v2250_v7 = vsel %vm936_vm2, %v2222_v18, %v2248_v19  ;;  %v2529_v18 = vrot.slane %v2503_v33, 1 }
 0x517   :  { %2347 = vmatprep.mubr.f32.mxu0 %v2250_v7  ;;  %v2531_v7 = vrot.slane %v2504_v35, 1 }
 0x518   :  { %2348 = vmatmul.mubr.f32.vlgmr.msra.gmra.mrb[8].mxu0 %v2249_v6 }
 0x519   :  { %2424 = vmatprep.mubr.f32.mxu0 %v3414_v40  ;;  %3083 = vmatpush1.bf16.msra.mxu0 %v3082_v8  ;;  %v2536_v8 = vrot.slane %v2506_v51, 1 }
 0x5eb   :  { %v3009_v9 = vpop.f32.mrb[8].mxu0 }
 0x5ec   :  { %v3010_v47 = vpop.f32.mrb[9].mxu0 }
 0x5ed   :  { %v3011_v48 = vadd.f32 %v3010_v47, %v3009_v9  ;;  %v2537_v47 = vrot.slane %v2508_v60, 1 }
 0x5ef   :  { %2937 = vmatmul.mubr.msk.f32.vlgmr.msra.gmra.mrb[10].mxu0 %vm1045_vm6, %v3011_v48  ;;  %v2541_v48 = vrot.slane %v2510_v1, 1 }
 0x6c2   :  { %v2426_v61 = vpop.f32.mrb[10].mxu0 }
 0x6c3   :  { %v2431_v11 = vmul.f32 %v2426_v61, %v2426_v61  ;;  %v2428_v12 = vpop.f32.mrb[11].mxu0 }
 0x6c4   :  { %v2432_v14 = vmul.f32 %v2428_v12, %v2428_v12 }
 0x6c5   :  { %v2435_v40 = vrot.slane %v2431_v11, 7  ;;  %v2535_v11 = vsel %vm97_vm0, %v2533_v23, %v2534_v13 }
 0x6c6   :  { %v2436_v3 = vrot.slane %v2432_v14, 7  ;;  %v2538_v14 = vsel %vm97_vm0, %v2536_v8, %v2537_v47 }
 0x6c7   :  { %v2439_v16 = vsub.f32 %v2426_v61, %v2435_v40 }
 0x6c8   :  { %v2440_v17 = vsub.f32 %v2428_v12, %v2436_v3  ;;  %v2542_v3 = vsel %vm97_vm0, %v2537_v47, %v2541_v48 }
 0x6c9   :  { %v2441_v20 = vadd.f32 1e-05, %v2439_v16 }
 0x6ca   :  { %v2442_v15 = vadd.f32 1e-05, %v2440_v17 }
 0x6cb   :  { %3410 = vrsqrt.f32 %v2441_v20 }
 0x6cc   :  { %3412 = vrsqrt.f32 %v2442_v15 }
 0x6d5   :  { %v3411_v22 = vpop.eup %3410 }
 0x6d6   :  { %v3413_v25 = vpop.eup %3412 }
 0x6d7   :  { %v2448_v26 = vcombine.low %v3411_v22, %v3413_v25 }
 0x6d9   :  { %v2455_v57 = vrot.slane %v2448_v26, %v4142_v42 }
 0x6db   :  { %v2456_v62 = vcombine.high %v2455_v57, %v2455_v57 }
 0x6dd   :  { %v2463_v52 = vrot.slane %v2456_v62, %v4142_v42 }
 0x6df   :  { %v2465_v27 = vmul.f32 %v2463_v52, %v2445_v46 }
 0x6e1   :  { %v2471_v31 = vrot.slane %v2465_v27, %v4149_v54  ;;  %v2475_v32 = vrot.slane %v2465_v27, %v4151_v55 }
 0x6e3   :  { %v2478_v43 = vmul.f32 %v2471_v31, %v2426_v61  ;;  %v2479_v44 = vmul.f32 %v2475_v32, %v2428_v12  ;;  %v2551_v56 = vmul.f32 %v2471_v31, %v4580_v41  ;;  %v2552_v59 = vmul.f32 %v2475_v32, %v4582_v34 }
 0x6e4   :  { %v2553_v5 = vmul.f32 %v2471_v31, %v4584_v10  ;;  %v2554_v2 = vmul.f32 %v2475_v32, %v4592_v63  ;;  %v2555_v41 = vmul.f32 %v2471_v31, %v4600_v21  ;;  %v2556_v34 = vmul.f32 %v2475_v32, %v4605_v24  ;;  %v2466_v63 = vld [vmem:[%s4728_s6] sm:$0x3] }
 0x6e5   :  { %v2482_v4 = vcombine.low %v2478_v43, %v2479_v44  ;;  %v2557_v19 = vmul.f32 %v2471_v31, %v4610_v49  ;;  %v2558_v6 = vmul.f32 %v2475_v32, %v4615_v45  ;;  %v2539_v10 = vrot.slane %v2509_v0, 1 }
 0x6e6   :  { %v2525_v24 = vsel %vm97_vm0, %v2523_v36, %v2524_v37  ;;  %v2528_v49 = vsel %vm97_vm0, %v2526_v39, %v2527_v38  ;;  %v2530_v45 = vsel %vm97_vm0, %v2524_v37, %v2529_v18  ;;  %v2532_v61 = vsel %vm97_vm0, %v2527_v38, %v2531_v7 }
 0x6e7   :  { %v2489_v9 = vrot.slane %v2482_v4, %v4142_v42  ;;  %v2540_v40 = vsel %vm97_vm0, %v2534_v13, %v2539_v10  ;;  %v2559_v16 = vadd.f32 %v2551_v56, %v2525_v24  ;;  %v2560_v17 = vadd.f32 %v2552_v59, %v2528_v49 }
 0x6e8   :  { %v2562_v20 = vadd.f32 %v2554_v2, %v2532_v61  ;;  %v2563_v25 = vadd.f32 %v2555_v41, %v2535_v11  ;;  %v2564_v26 = vadd.f32 %v2556_v34, %v2538_v14  ;;  %v2565_v57 = vadd.f32 %v2557_v19, %v2540_v40 }
 0x6e9   :  { %v2496_v21 = vrot.slane %v2489_v9, %v4142_v42  ;;  %v2561_v42 = vadd.f32 %v2553_v5, %v2530_v45  ;;  %v2566_v62 = vadd.f32 %v2558_v6, %v2542_v3 }
 0x6eb   :  { %v2498_v12 = vsub.f32 %v2466_v63, %v2496_v21 }
 0x6ed   :  { %v2571_v15 = vrot.slane %v2498_v12, %v4149_v54  ;;  %v2575_v22 = vrot.slane %v2498_v12, %v4151_v55 }
 0x6ef   :  { %v2578_v46 = vadd.f32 %v2571_v15, %v2559_v16  ;;  %v2579_v52 = vadd.f32 %v2575_v22, %v2560_v17  ;;  %v2580_v58 = vadd.f32 %v2571_v15, %v2561_v42  ;;  %v2581_v27 = vadd.f32 %v2575_v22, %v2562_v20 }
 0x6f0   :  { %v2582_v28 = vadd.f32 %v2571_v15, %v2563_v25  ;;  %v2583_v29 = vadd.f32 %v2575_v22, %v2564_v26  ;;  %v2584_v30 = vadd.f32 %v2571_v15, %v2565_v57  ;;  %v2585_v31 = vadd.f32 %v2575_v22, %v2566_v62 }
 0x6f1   :  { %2586 = vst [vmem:[%s4729_s9] sm:$0xff] %v2578_v46  ;;  %2587 = vst [vmem:[%s4729_s9 + $0x8] sm:$0xff] %v2579_v52 }
 0x6f2   :  { %2588 = vst [vmem:[%s4729_s9 + $0x10] sm:$0xff] %v2580_v58  ;;  %2589 = vst [vmem:[%s4729_s9 + $0x18] sm:$0xff] %v2581_v27 }
 0x6f3   :  { %2590 = vst [vmem:[%s4729_s9 + $0x20] sm:$0xff] %v2582_v28  ;;  %2591 = vst [vmem:[%s4729_s9 + $0x28] sm:$0xff] %v2583_v29 }
 0x6f4   :  { %2592 = vst [vmem:[%s4729_s9 + $0x30] sm:$0xff] %v2584_v30  ;;  %2593 = vst [vmem:[%s4729_s9 + $0x38] sm:$0xff] %v2585_v31 }

</bundles_post_ra>
